<compile_context>
chip_gen: v6e
topology: v6e:2x2x1
jax: 0.10.0
libtpu: 0.0.40
codegen_flags: <defaults>
</compile_context>

<pallas_src>
import jax
import jax.numpy as jnp
from jax.experimental import pallas as pl
from jax.experimental.pallas import tpu as pltpu
import numpy as np

AGENT_DIM = 5
ENV_DIM = 8
OPP_DIM = 5
INT_DIM = 4
OPP_SLOT = OPP_DIM + INT_DIM + 1      # 10 values per opponent
AE_DIM = AGENT_DIM + ENV_DIM          # 13


def _attn_mlp_kernel(
    # per-row data tiles
    ae_in_ref, opp_dyn_ref, opp_int_ref, opp_act_ref,
    # group selectors (local to the row tile): R (TB*K, TB), S (TB, TB*K)
    r_ref, s_ref,
    # fused agent+env trunk
    w_ae1_ref, b_ae1_ref, w_ae2_ref, b_ae2_ref,
    # opponent trunk
    w_o1_ref, b_o1_ref, w_o2_ref, b_o2_ref,
    # agent-opponent encoder (concat realised as split matmuls)
    w_e1a_ref, w_e1b_ref, b_e1_ref, w_e2_ref, b_e2_ref,
    # attention model
    w_t1a_ref, w_t1b_ref, b_t1_ref, w_t2_ref, b_t2_ref,
    # fused actor/critic trunk
    w_ac1a_ref, w_ac1b_ref, b_ac1_ref, w_ac2_ref, b_ac2_ref,
    # output projection: [hidden_actor | value] into one 128-lane slab
    w_out_ref, b_out_ref,
    # output
    out_ref,
):
    f32 = jnp.float32
    dot = lambda a, b: jnp.dot(a, b, preferred_element_type=f32)

    # --- agent + env trunks, fused (block-diagonal weights) -> (TB, 2H) ---
    ae = jnp.tanh(dot(ae_in_ref[...], w_ae1_ref[...]) + b_ae1_ref[...])
    ae = jnp.tanh(dot(ae, w_ae2_ref[...]) + b_ae2_ref[...])   # [agent | env]

    # --- opponent dynamics encoder -> (TB*K, H) ---
    oenc = jnp.tanh(dot(opp_dyn_ref[...], w_o1_ref[...]) + b_o1_ref[...])
    oenc = jnp.tanh(dot(oenc, w_o2_ref[...]) + b_o2_ref[...])

    # --- broadcast agent+env state to every opponent row (selector matmul,
    #     equivalent to .repeat(1,K).view(B*K,-1); avoids in-kernel reshape) ---
    ae_exp = dot(r_ref[...], ae)                               # (TB*K, 2H)

    act = opp_act_ref[...]                                     # (TB*K, 1)

    # --- agentopponent_encoder: cat(ae_exp, oenc)*act -> Lin-tanh-Lin ---
    h1 = jnp.tanh(dot(ae_exp * act, w_e1a_ref[...])
                  + dot(oenc * act, w_e1b_ref[...]) + b_e1_ref[...])
    denc = dot(h1, w_e2_ref[...]) + b_e2_ref[...]              # no final tanh

    # --- attention logits: cat(denc, intention) -> Lin-tanh-Lin(.,1) ---
    a1 = jnp.tanh(dot(denc, w_t1a_ref[...])
                  + dot(opp_int_ref[...], w_t1b_ref[...]) + b_t1_ref[...])
    logit = (dot(a1, w_t2_ref[...]) + b_t2_ref[...]) * act     # (TB*K, 1)

    # --- grouped softmax over the K opponents of each batch row.
    #     A single global max shift is constant within every group => softmax
    #     is unchanged, and grouping is done with selector matmuls
    #     (no reshapes, no per-group reductions). ---
    e = jnp.exp(logit - jnp.max(logit, axis=0, keepdims=True))
    gsum = dot(s_ref[...], e)                                  # (TB, 1)
    attw = e / dot(r_ref[...], gsum)                           # (TB*K, 1)
    attended = dot(s_ref[...], attw * denc)                    # (TB, H)

    # --- actor / critic trunks fused 2H wide (concat input via split matmuls) ---
    t = jnp.tanh(dot(ae, w_ac1a_ref[...]) + dot(attended, w_ac1b_ref[...])
                 + b_ac1_ref[...])
    t = jnp.tanh(dot(t, w_ac2_ref[...]) + b_ac2_ref[...])      # [actor | critic]

    # --- single lane-dense output slab: cols 0:H = hidden_actor, col H = value ---
    out_ref[...] = dot(t, w_out_ref[...]) + b_out_ref[...]


def _build_fused(p, H, out_w):
    """Build the fused / split weight matrices used by the kernel."""
    f32 = jnp.float32
    H2 = 2 * H

    # agent+env first layer: block-diagonal (13, 2H)
    w_ae1 = jnp.zeros((AE_DIM, H2), f32)
    w_ae1 = w_ae1.at[:AGENT_DIM, :H].set(p["agent_w1"])
    w_ae1 = w_ae1.at[AGENT_DIM:, H:].set(p["env_w1"])
    b_ae1 = jnp.concatenate([p["agent_b1"], p["env_b1"]], axis=1)
    # agent+env second layer: block-diagonal (2H, 2H)
    w_ae2 = jnp.zeros((H2, H2), f32)
    w_ae2 = w_ae2.at[:H, :H].set(p["agent_w2"])
    w_ae2 = w_ae2.at[H:, H:].set(p["env_w2"])
    b_ae2 = jnp.concatenate([p["agent_b2"], p["env_b2"]], axis=1)

    # agentopponent_encoder layer-1 weight split for the (2H | H) concat input
    w_e1a = p["enc_w1"][:H2, :]
    w_e1b = p["enc_w1"][H2:, :]
    # attention layer-1 weight split for the (H | 4) concat input
    w_t1a = p["att_w1"][:H, :]
    w_t1b = p["att_w1"][H:, :]

    # actor+critic first layer fused along the output dim: (3H, 2H), split rows
    w_ac1 = jnp.concatenate([p["actor_w1"], p["critic_w1"]], axis=1)
    w_ac1a = w_ac1[:H2, :]
    w_ac1b = w_ac1[H2:, :]
    b_ac1 = jnp.concatenate([p["actor_b1"], p["critic_b1"]], axis=1)
    # actor+critic second layer: block-diagonal (2H, 2H)
    w_ac2 = jnp.zeros((H2, H2), f32)
    w_ac2 = w_ac2.at[:H, :H].set(p["actor_w2"])
    w_ac2 = w_ac2.at[H:, H:].set(p["critic_w2"])
    b_ac2 = jnp.concatenate([p["actor_b2"], p["critic_b2"]], axis=1)

    # output projection (2H, out_w): identity for hidden_actor, critic_linear col
    w_out = jnp.zeros((H2, out_w), f32)
    w_out = w_out.at[:H, :H].set(jnp.eye(H, dtype=f32))
    w_out = w_out.at[H:, H:H + 1].set(p["cl_w"])
    b_out = jnp.zeros((1, out_w), f32).at[0, H].set(p["cl_b"][0, 0])

    return (w_ae1, b_ae1, w_ae2, b_ae2,
            p["opp_w1"], p["opp_b1"], p["opp_w2"], p["opp_b2"],
            w_e1a, w_e1b, p["enc_b1"], p["enc_w2"], p["enc_b2"],
            w_t1a, w_t1b, p["att_b1"], p["att_w2"], p["att_b2"],
            w_ac1a, w_ac1b, b_ac1, w_ac2, b_ac2,
            w_out, b_out)


@jax.jit
def attn_mlp_forward(x, rnn_hxs, masks, params):
    """Pallas forward for AttnMLP (recurrent=False).

    x:       (B, num_inputs) f32 with num_inputs = 13 + 10*K
    returns: (value (B,1), hidden_actor (B,H), rnn_hxs passthrough)
    """
    del masks  # unused when is_recurrent == False
    B, num_inputs = x.shape
    H = params["agent_w1"].shape[1]
    if (num_inputs - AE_DIM) % OPP_SLOT != 0:
        raise ValueError("num_inputs does not match AttnMLP layout")
    K = (num_inputs - AE_DIM) // OPP_SLOT
    if K <= 0:
        raise NotImplementedError("num_opponents == 0 path not implemented")

    # Pad batch rows to a multiple of 8 (sublane) and pick a row tile.
    if B > 128:
        TB = 128
    else:
        TB = max(8, ((B + 7) // 8) * 8)
    B_pad = ((B + TB - 1) // TB) * TB
    x_p = jnp.pad(x, ((0, B_pad - B), (0, 0))) if B_pad != B else x
    nb = B_pad // TB

    out_w = ((H + 1 + 127) // 128) * 128   # lane-dense output slab width
    fused = _build_fused(params, H, out_w)

    # Wrapper-side slicing / reshaping (layout plumbing, not compute).
    ae_in = x_p[:, :AE_DIM]                                        # (B_pad, 13)
    opp = x_p[:, AE_DIM:].reshape(B_pad * K, OPP_SLOT)             # (B_pad*K, 10)
    opp_dyn = opp[:, :OPP_DIM]
    opp_int = opp[:, OPP_DIM:OPP_DIM + INT_DIM]
    opp_act = opp[:, OPP_SLOT - 1:]

    # Local group selectors for one row tile: R[b*K+k, b] = 1, S = R.T
    r_sel = jnp.repeat(jnp.eye(TB, dtype=jnp.float32), K, axis=0)  # (TB*K, TB)
    s_sel = r_sel.T                                                # (TB, TB*K)

    data = (ae_in, opp_dyn, opp_int, opp_act)
    consts = (r_sel, s_sel) + fused

    in_specs = [
        pl.BlockSpec((TB, AE_DIM), lambda i: (i, 0)),
        pl.BlockSpec((TB * K, OPP_DIM), lambda i: (i, 0)),
        pl.BlockSpec((TB * K, INT_DIM), lambda i: (i, 0)),
        pl.BlockSpec((TB * K, 1), lambda i: (i, 0)),
    ] + [pl.BlockSpec(a.shape, lambda i: (0, 0)) for a in consts]

    out = pl.pallas_call(
        _attn_mlp_kernel,
        out_shape=jax.ShapeDtypeStruct((B_pad, out_w), jnp.float32),
        grid=(nb,),
        in_specs=in_specs,
        out_specs=pl.BlockSpec((TB, out_w), lambda i: (i, 0)),
        compiler_params=pltpu.CompilerParams(
            dimension_semantics=("parallel",)),
    )(*data, *consts)

    hidden_actor = out[:B, :H]
    value = out[:B, H:H + 1]
    return value, hidden_actor, rnn_hxs


def make_params(key, hidden_size):
    """Orthogonal(gain=sqrt(2)) weights, zero biases, stored (in, out)."""
    H = hidden_size
    ortho = jax.nn.initializers.orthogonal(scale=float(np.sqrt(2.0)))
    keys = jax.random.split(key, 15)

    def lin(k, fi, fo):
        return ortho(k, (fi, fo), jnp.float32), jnp.zeros((1, fo), jnp.float32)

    p = {}
    p["agent_w1"], p["agent_b1"] = lin(keys[0], AGENT_DIM, H)
    p["agent_w2"], p["agent_b2"] = lin(keys[1], H, H)
    p["env_w1"], p["env_b1"] = lin(keys[2], ENV_DIM, H)
    p["env_w2"], p["env_b2"] = lin(keys[3], H, H)
    p["opp_w1"], p["opp_b1"] = lin(keys[4], OPP_DIM, H)
    p["opp_w2"], p["opp_b2"] = lin(keys[5], H, H)
    p["enc_w1"], p["enc_b1"] = lin(keys[6], 3 * H, H)
    p["enc_w2"], p["enc_b2"] = lin(keys[7], H, H)
    p["att_w1"], p["att_b1"] = lin(keys[8], H + INT_DIM, H)
    p["att_w2"], p["att_b2"] = lin(keys[9], H, 1)
    p["actor_w1"], p["actor_b1"] = lin(keys[10], 3 * H, H)
    p["actor_w2"], p["actor_b2"] = lin(keys[11], H, H)
    p["critic_w1"], p["critic_b1"] = lin(keys[12], 3 * H, H)
    p["critic_w2"], p["critic_b2"] = lin(keys[13], H, H)
    p["cl_w"], p["cl_b"] = lin(keys[14], H, 1)
    return p


def reference_forward(x, rnn_hxs, params):
    """Pure-JAX mirror of AttnMLP.forward (recurrent=False)."""
    H = params["agent_w1"].shape[1]
    B = x.shape[0]
    K = (x.shape[1] - AE_DIM) // OPP_SLOT

    def mlp2(z, w1, b1, w2, b2, final_tanh=True):
        h = jnp.tanh(z @ w1 + b1)
        h = h @ w2 + b2
        return jnp.tanh(h) if final_tanh else h

    agent = mlp2(x[:, :AGENT_DIM], params["agent_w1"], params["agent_b1"],
                 params["agent_w2"], params["agent_b2"])
    env = mlp2(x[:, AGENT_DIM:AE_DIM], params["env_w1"], params["env_b1"],
               params["env_w2"], params["env_b2"])
    ae = jnp.concatenate([agent, env], axis=-1)
    ae_exp = jnp.repeat(ae, K, axis=0)

    opp = x[:, AE_DIM:].reshape(B * K, OPP_SLOT)
    intention = opp[:, OPP_DIM:OPP_DIM + INT_DIM]
    active = opp[:, OPP_SLOT - 1:]
    oenc = mlp2(opp[:, :OPP_DIM], params["opp_w1"], params["opp_b1"],
                params["opp_w2"], params["opp_b2"])

    z = jnp.concatenate([ae_exp, oenc], axis=-1) * active
    denc = mlp2(z, params["enc_w1"], params["enc_b1"],
                params["enc_w2"], params["enc_b2"], final_tanh=False)

    a1 = jnp.tanh(jnp.concatenate([denc, intention], axis=-1) @ params["att_w1"]
                  + params["att_b1"])
    logit = (a1 @ params["att_w2"] + params["att_b2"]) * active
    attw = jax.nn.softmax(logit.reshape(B, K), axis=1)[:, :, None]
    attended = (denc.reshape(B, K, H) * attw).sum(axis=1)

    feat = jnp.concatenate([agent, env, attended], axis=-1)
    hc = mlp2(feat, params["critic_w1"], params["critic_b1"],
              params["critic_w2"], params["critic_b2"])
    ha = mlp2(feat, params["actor_w1"], params["actor_b1"],
              params["actor_w2"], params["actor_b2"])
    value = hc @ params["cl_w"] + params["cl_b"]
    return value, ha, rnn_hxs


if __name__ == "__main__":
    B = 6            # batch (deliberately not a multiple of 8: exercises padding)
    HIDDEN = 32      # AttnMLP default hidden_size
    K = 3            # num_opponents
    NUM_INPUTS = AE_DIM + OPP_SLOT * K   # 43

    key = jax.random.PRNGKey(0)
    k_param, k_x, k_act = jax.random.split(key, 3)

    params = make_params(k_param, HIDDEN)
    x = jax.random.normal(k_x, (B, NUM_INPUTS), jnp.float32)
    # make the per-opponent "active" flags 0/1 like the real environment
    active_flags = jax.random.bernoulli(k_act, 0.7, (B, K)).astype(jnp.float32)
    x = x.at[:, AE_DIM + OPP_SLOT - 1::OPP_SLOT].set(active_flags)

    rnn_hxs = jnp.zeros((B, 1), jnp.float32)   # non-recurrent => size 1
    masks = jnp.ones((B, 1), jnp.float32)

    value, hidden_actor, rnn_hxs_out = attn_mlp_forward(x, rnn_hxs, masks, params)
    jax.block_until_ready((value, hidden_actor, rnn_hxs_out))

    v_ref, a_ref, _ = reference_forward(x, rnn_hxs, params)
    np.testing.assert_allclose(np.asarray(value), np.asarray(v_ref),
                               rtol=1e-4, atol=1e-5)
    np.testing.assert_allclose(np.asarray(hidden_actor), np.asarray(a_ref),
                               rtol=1e-4, atol=1e-5)
    assert value.shape == (B, 1)
    assert hidden_actor.shape == (B, HIDDEN)
    assert rnn_hxs_out.shape == (B, 1)

    print("KERNEL_OK")
</pallas_src>

<mosaic_0001>
module attributes {stable_mosaic.version = 11 : i64} {
  func.func @_attn_mlp_kernel(%arg0: i32, %arg1: memref<8x13xf32, #tpu.memory_space<vmem>>, %arg2: memref<24x5xf32, #tpu.memory_space<vmem>>, %arg3: memref<24x4xf32, #tpu.memory_space<vmem>>, %arg4: memref<24x1xf32, #tpu.memory_space<vmem>>, %arg5: memref<24x8xf32, #tpu.memory_space<vmem>>, %arg6: memref<8x24xf32, #tpu.memory_space<vmem>>, %arg7: memref<13x64xf32, #tpu.memory_space<vmem>>, %arg8: memref<1x64xf32, #tpu.memory_space<vmem>>, %arg9: memref<64x64xf32, #tpu.memory_space<vmem>>, %arg10: memref<1x64xf32, #tpu.memory_space<vmem>>, %arg11: memref<5x32xf32, #tpu.memory_space<vmem>>, %arg12: memref<1x32xf32, #tpu.memory_space<vmem>>, %arg13: memref<32x32xf32, #tpu.memory_space<vmem>>, %arg14: memref<1x32xf32, #tpu.memory_space<vmem>>, %arg15: memref<64x32xf32, #tpu.memory_space<vmem>>, %arg16: memref<32x32xf32, #tpu.memory_space<vmem>>, %arg17: memref<1x32xf32, #tpu.memory_space<vmem>>, %arg18: memref<32x32xf32, #tpu.memory_space<vmem>>, %arg19: memref<1x32xf32, #tpu.memory_space<vmem>>, %arg20: memref<32x32xf32, #tpu.memory_space<vmem>>, %arg21: memref<4x32xf32, #tpu.memory_space<vmem>>, %arg22: memref<1x32xf32, #tpu.memory_space<vmem>>, %arg23: memref<32x1xf32, #tpu.memory_space<vmem>>, %arg24: memref<1x1xf32, #tpu.memory_space<vmem>>, %arg25: memref<64x64xf32, #tpu.memory_space<vmem>>, %arg26: memref<32x64xf32, #tpu.memory_space<vmem>>, %arg27: memref<1x64xf32, #tpu.memory_space<vmem>>, %arg28: memref<64x64xf32, #tpu.memory_space<vmem>>, %arg29: memref<1x64xf32, #tpu.memory_space<vmem>>, %arg30: memref<64x128xf32, #tpu.memory_space<vmem>>, %arg31: memref<1x128xf32, #tpu.memory_space<vmem>>, %arg32: memref<8x128xf32, #tpu.memory_space<vmem>>) attributes {dimension_semantics = [#tpu.dimension_semantics<parallel>], iteration_bounds = array<i64: 1>, scalar_prefetch = 0 : i64, scratch_operands = 0 : i64, tpu.core_type = #tpu.core_type<tc>, window_params = [{transform_indices = @transform_0, window_bounds = array<i64: 8, 13>}, {transform_indices = @transform_1, window_bounds = array<i64: 24, 5>}, {transform_indices = @transform_2, window_bounds = array<i64: 24, 4>}, {transform_indices = @transform_3, window_bounds = array<i64: 24, 1>}, {pipeline_mode = #tpu.pipeline_mode<synchronous>, transform_indices = @transform_4, window_bounds = array<i64: 24, 8>}, {pipeline_mode = #tpu.pipeline_mode<synchronous>, transform_indices = @transform_5, window_bounds = array<i64: 8, 24>}, {pipeline_mode = #tpu.pipeline_mode<synchronous>, transform_indices = @transform_6, window_bounds = array<i64: 13, 64>}, {pipeline_mode = #tpu.pipeline_mode<synchronous>, transform_indices = @transform_7, window_bounds = array<i64: 1, 64>}, {pipeline_mode = #tpu.pipeline_mode<synchronous>, transform_indices = @transform_8, window_bounds = array<i64: 64, 64>}, {pipeline_mode = #tpu.pipeline_mode<synchronous>, transform_indices = @transform_9, window_bounds = array<i64: 1, 64>}, {pipeline_mode = #tpu.pipeline_mode<synchronous>, transform_indices = @transform_10, window_bounds = array<i64: 5, 32>}, {pipeline_mode = #tpu.pipeline_mode<synchronous>, transform_indices = @transform_11, window_bounds = array<i64: 1, 32>}, {pipeline_mode = #tpu.pipeline_mode<synchronous>, transform_indices = @transform_12, window_bounds = array<i64: 32, 32>}, {pipeline_mode = #tpu.pipeline_mode<synchronous>, transform_indices = @transform_13, window_bounds = array<i64: 1, 32>}, {pipeline_mode = #tpu.pipeline_mode<synchronous>, transform_indices = @transform_14, window_bounds = array<i64: 64, 32>}, {pipeline_mode = #tpu.pipeline_mode<synchronous>, transform_indices = @transform_15, window_bounds = array<i64: 32, 32>}, {pipeline_mode = #tpu.pipeline_mode<synchronous>, transform_indices = @transform_16, window_bounds = array<i64: 1, 32>}, {pipeline_mode = #tpu.pipeline_mode<synchronous>, transform_indices = @transform_17, window_bounds = array<i64: 32, 32>}, {pipeline_mode = #tpu.pipeline_mode<synchronous>, transform_indices = @transform_18, window_bounds = array<i64: 1, 32>}, {pipeline_mode = #tpu.pipeline_mode<synchronous>, transform_indices = @transform_19, window_bounds = array<i64: 32, 32>}, {pipeline_mode = #tpu.pipeline_mode<synchronous>, transform_indices = @transform_20, window_bounds = array<i64: 4, 32>}, {pipeline_mode = #tpu.pipeline_mode<synchronous>, transform_indices = @transform_21, window_bounds = array<i64: 1, 32>}, {pipeline_mode = #tpu.pipeline_mode<synchronous>, transform_indices = @transform_22, window_bounds = array<i64: 32, 1>}, {pipeline_mode = #tpu.pipeline_mode<synchronous>, transform_indices = @transform_23, window_bounds = array<i64: 1, 1>}, {pipeline_mode = #tpu.pipeline_mode<synchronous>, transform_indices = @transform_24, window_bounds = array<i64: 64, 64>}, {pipeline_mode = #tpu.pipeline_mode<synchronous>, transform_indices = @transform_25, window_bounds = array<i64: 32, 64>}, {pipeline_mode = #tpu.pipeline_mode<synchronous>, transform_indices = @transform_26, window_bounds = array<i64: 1, 64>}, {pipeline_mode = #tpu.pipeline_mode<synchronous>, transform_indices = @transform_27, window_bounds = array<i64: 64, 64>}, {pipeline_mode = #tpu.pipeline_mode<synchronous>, transform_indices = @transform_28, window_bounds = array<i64: 1, 64>}, {pipeline_mode = #tpu.pipeline_mode<synchronous>, transform_indices = @transform_29, window_bounds = array<i64: 64, 128>}, {pipeline_mode = #tpu.pipeline_mode<synchronous>, transform_indices = @transform_30, window_bounds = array<i64: 1, 128>}, {transform_indices = @transform_31, window_bounds = array<i64: 8, 128>}]} {
    %c0 = arith.constant 0 : index
    %c0_0 = arith.constant 0 : index
    %0 = vector.load %arg1[%c0, %c0_0] : memref<8x13xf32, #tpu.memory_space<vmem>>, vector<8x13xf32>
    %c0_1 = arith.constant 0 : index
    %c0_2 = arith.constant 0 : index
    %1 = vector.load %arg7[%c0_1, %c0_2] : memref<13x64xf32, #tpu.memory_space<vmem>>, vector<13x64xf32>
    %cst = arith.constant dense<0.000000e+00> : vector<8x64xf32>
    %2 = tpu.matmul %0, %1, %cst {dimension_numbers = #tpu.dot_dimension_numbers<[1], [0], [0], [1], [0, 0, 1, 1], [], []>} : vector<8x13xf32>, vector<13x64xf32>, vector<8x64xf32> -> vector<8x64xf32>
    %c0_3 = arith.constant 0 : index
    %c0_4 = arith.constant 0 : index
    %3 = vector.load %arg8[%c0_3, %c0_4] : memref<1x64xf32, #tpu.memory_space<vmem>>, vector<1x64xf32>
    %4 = vector.broadcast %3 : vector<1x64xf32> to vector<8x64xf32>
    %5 = arith.addf %2, %4 : vector<8x64xf32>
    %6 = math.tanh %5 : vector<8x64xf32>
    %c0_5 = arith.constant 0 : index
    %c0_6 = arith.constant 0 : index
    %7 = vector.load %arg9[%c0_5, %c0_6] : memref<64x64xf32, #tpu.memory_space<vmem>>, vector<64x64xf32>
    %cst_7 = arith.constant dense<0.000000e+00> : vector<8x64xf32>
    %8 = tpu.matmul %6, %7, %cst_7 {dimension_numbers = #tpu.dot_dimension_numbers<[1], [0], [0], [1], [0, 0, 1, 1], [], []>} : vector<8x64xf32>, vector<64x64xf32>, vector<8x64xf32> -> vector<8x64xf32>
    %c0_8 = arith.constant 0 : index
    %c0_9 = arith.constant 0 : index
    %9 = vector.load %arg10[%c0_8, %c0_9] : memref<1x64xf32, #tpu.memory_space<vmem>>, vector<1x64xf32>
    %10 = vector.broadcast %9 : vector<1x64xf32> to vector<8x64xf32>
    %11 = arith.addf %8, %10 : vector<8x64xf32>
    %12 = math.tanh %11 : vector<8x64xf32>
    %c0_10 = arith.constant 0 : index
    %c0_11 = arith.constant 0 : index
    %13 = vector.load %arg2[%c0_10, %c0_11] : memref<24x5xf32, #tpu.memory_space<vmem>>, vector<24x5xf32>
    %c0_12 = arith.constant 0 : index
    %c0_13 = arith.constant 0 : index
    %14 = vector.load %arg11[%c0_12, %c0_13] : memref<5x32xf32, #tpu.memory_space<vmem>>, vector<5x32xf32>
    %cst_14 = arith.constant dense<0.000000e+00> : vector<24x32xf32>
    %15 = tpu.matmul %13, %14, %cst_14 {dimension_numbers = #tpu.dot_dimension_numbers<[1], [0], [0], [1], [0, 0, 1, 1], [], []>} : vector<24x5xf32>, vector<5x32xf32>, vector<24x32xf32> -> vector<24x32xf32>
    %c0_15 = arith.constant 0 : index
    %c0_16 = arith.constant 0 : index
    %16 = vector.load %arg12[%c0_15, %c0_16] : memref<1x32xf32, #tpu.memory_space<vmem>>, vector<1x32xf32>
    %17 = vector.broadcast %16 : vector<1x32xf32> to vector<24x32xf32>
    %18 = arith.addf %15, %17 : vector<24x32xf32>
    %19 = math.tanh %18 : vector<24x32xf32>
    %c0_17 = arith.constant 0 : index
    %c0_18 = arith.constant 0 : index
    %20 = vector.load %arg13[%c0_17, %c0_18] : memref<32x32xf32, #tpu.memory_space<vmem>>, vector<32x32xf32>
    %cst_19 = arith.constant dense<0.000000e+00> : vector<24x32xf32>
    %21 = tpu.matmul %19, %20, %cst_19 {dimension_numbers = #tpu.dot_dimension_numbers<[1], [0], [0], [1], [0, 0, 1, 1], [], []>} : vector<24x32xf32>, vector<32x32xf32>, vector<24x32xf32> -> vector<24x32xf32>
    %c0_20 = arith.constant 0 : index
    %c0_21 = arith.constant 0 : index
    %22 = vector.load %arg14[%c0_20, %c0_21] : memref<1x32xf32, #tpu.memory_space<vmem>>, vector<1x32xf32>
    %23 = vector.broadcast %22 : vector<1x32xf32> to vector<24x32xf32>
    %24 = arith.addf %21, %23 : vector<24x32xf32>
    %25 = math.tanh %24 : vector<24x32xf32>
    %c0_22 = arith.constant 0 : index
    %c0_23 = arith.constant 0 : index
    %26 = vector.load %arg5[%c0_22, %c0_23] : memref<24x8xf32, #tpu.memory_space<vmem>>, vector<24x8xf32>
    %cst_24 = arith.constant dense<0.000000e+00> : vector<24x64xf32>
    %27 = tpu.matmul %26, %12, %cst_24 {dimension_numbers = #tpu.dot_dimension_numbers<[1], [0], [0], [1], [0, 0, 1, 1], [], []>} : vector<24x8xf32>, vector<8x64xf32>, vector<24x64xf32> -> vector<24x64xf32>
    %c0_25 = arith.constant 0 : index
    %c0_26 = arith.constant 0 : index
    %28 = vector.load %arg4[%c0_25, %c0_26] : memref<24x1xf32, #tpu.memory_space<vmem>>, vector<24x1xf32>
    %29 = vector.broadcast %28 : vector<24x1xf32> to vector<24x64xf32>
    %30 = arith.mulf %27, %29 : vector<24x64xf32>
    %c0_27 = arith.constant 0 : index
    %c0_28 = arith.constant 0 : index
    %31 = vector.load %arg15[%c0_27, %c0_28] : memref<64x32xf32, #tpu.memory_space<vmem>>, vector<64x32xf32>
    %cst_29 = arith.constant dense<0.000000e+00> : vector<24x32xf32>
    %32 = tpu.matmul %30, %31, %cst_29 {dimension_numbers = #tpu.dot_dimension_numbers<[1], [0], [0], [1], [0, 0, 1, 1], [], []>} : vector<24x64xf32>, vector<64x32xf32>, vector<24x32xf32> -> vector<24x32xf32>
    %33 = vector.broadcast %28 : vector<24x1xf32> to vector<24x32xf32>
    %34 = arith.mulf %25, %33 : vector<24x32xf32>
    %c0_30 = arith.constant 0 : index
    %c0_31 = arith.constant 0 : index
    %35 = vector.load %arg16[%c0_30, %c0_31] : memref<32x32xf32, #tpu.memory_space<vmem>>, vector<32x32xf32>
    %cst_32 = arith.constant dense<0.000000e+00> : vector<24x32xf32>
    %36 = tpu.matmul %34, %35, %cst_32 {dimension_numbers = #tpu.dot_dimension_numbers<[1], [0], [0], [1], [0, 0, 1, 1], [], []>} : vector<24x32xf32>, vector<32x32xf32>, vector<24x32xf32> -> vector<24x32xf32>
    %37 = arith.addf %32, %36 : vector<24x32xf32>
    %c0_33 = arith.constant 0 : index
    %c0_34 = arith.constant 0 : index
    %38 = vector.load %arg17[%c0_33, %c0_34] : memref<1x32xf32, #tpu.memory_space<vmem>>, vector<1x32xf32>
    %39 = vector.broadcast %38 : vector<1x32xf32> to vector<24x32xf32>
    %40 = arith.addf %37, %39 : vector<24x32xf32>
    %41 = math.tanh %40 : vector<24x32xf32>
    %c0_35 = arith.constant 0 : index
    %c0_36 = arith.constant 0 : index
    %42 = vector.load %arg18[%c0_35, %c0_36] : memref<32x32xf32, #tpu.memory_space<vmem>>, vector<32x32xf32>
    %cst_37 = arith.constant dense<0.000000e+00> : vector<24x32xf32>
    %43 = tpu.matmul %41, %42, %cst_37 {dimension_numbers = #tpu.dot_dimension_numbers<[1], [0], [0], [1], [0, 0, 1, 1], [], []>} : vector<24x32xf32>, vector<32x32xf32>, vector<24x32xf32> -> vector<24x32xf32>
    %c0_38 = arith.constant 0 : index
    %c0_39 = arith.constant 0 : index
    %44 = vector.load %arg19[%c0_38, %c0_39] : memref<1x32xf32, #tpu.memory_space<vmem>>, vector<1x32xf32>
    %45 = vector.broadcast %44 : vector<1x32xf32> to vector<24x32xf32>
    %46 = arith.addf %43, %45 : vector<24x32xf32>
    %c0_40 = arith.constant 0 : index
    %c0_41 = arith.constant 0 : index
    %47 = vector.load %arg20[%c0_40, %c0_41] : memref<32x32xf32, #tpu.memory_space<vmem>>, vector<32x32xf32>
    %cst_42 = arith.constant dense<0.000000e+00> : vector<24x32xf32>
    %48 = tpu.matmul %46, %47, %cst_42 {dimension_numbers = #tpu.dot_dimension_numbers<[1], [0], [0], [1], [0, 0, 1, 1], [], []>} : vector<24x32xf32>, vector<32x32xf32>, vector<24x32xf32> -> vector<24x32xf32>
    %c0_43 = arith.constant 0 : index
    %c0_44 = arith.constant 0 : index
    %49 = vector.load %arg3[%c0_43, %c0_44] : memref<24x4xf32, #tpu.memory_space<vmem>>, vector<24x4xf32>
    %c0_45 = arith.constant 0 : index
    %c0_46 = arith.constant 0 : index
    %50 = vector.load %arg21[%c0_45, %c0_46] : memref<4x32xf32, #tpu.memory_space<vmem>>, vector<4x32xf32>
    %cst_47 = arith.constant dense<0.000000e+00> : vector<24x32xf32>
    %51 = tpu.matmul %49, %50, %cst_47 {dimension_numbers = #tpu.dot_dimension_numbers<[1], [0], [0], [1], [0, 0, 1, 1], [], []>} : vector<24x4xf32>, vector<4x32xf32>, vector<24x32xf32> -> vector<24x32xf32>
    %52 = arith.addf %48, %51 : vector<24x32xf32>
    %c0_48 = arith.constant 0 : index
    %c0_49 = arith.constant 0 : index
    %53 = vector.load %arg22[%c0_48, %c0_49] : memref<1x32xf32, #tpu.memory_space<vmem>>, vector<1x32xf32>
    %54 = vector.broadcast %53 : vector<1x32xf32> to vector<24x32xf32>
    %55 = arith.addf %52, %54 : vector<24x32xf32>
    %56 = math.tanh %55 : vector<24x32xf32>
    %c0_50 = arith.constant 0 : index
    %c0_51 = arith.constant 0 : index
    %57 = vector.load %arg23[%c0_50, %c0_51] : memref<32x1xf32, #tpu.memory_space<vmem>>, vector<32x1xf32>
    %cst_52 = arith.constant dense<0.000000e+00> : vector<24x1xf32>
    %58 = tpu.matmul %56, %57, %cst_52 {dimension_numbers = #tpu.dot_dimension_numbers<[1], [0], [0], [1], [0, 0, 1, 1], [], []>} : vector<24x32xf32>, vector<32x1xf32>, vector<24x1xf32> -> vector<24x1xf32>
    %c0_53 = arith.constant 0 : index
    %c0_54 = arith.constant 0 : index
    %59 = vector.load %arg24[%c0_53, %c0_54] : memref<1x1xf32, #tpu.memory_space<vmem>>, vector<1x1xf32>
    %60 = vector.broadcast %59 : vector<1x1xf32> to vector<24x1xf32>
    %61 = arith.addf %58, %60 : vector<24x1xf32>
    %62 = arith.mulf %61, %28 : vector<24x1xf32>
    %cst_55 = arith.constant dense<0xFF800000> : vector<1xf32>
    %63 = vector.multi_reduction <maximumf>, %62, %cst_55 [0] : vector<24x1xf32> to vector<1xf32>
    %64 = vector.shape_cast %63 : vector<1xf32> to vector<1x1xf32>
    %65 = vector.broadcast %64 : vector<1x1xf32> to vector<24x1xf32>
    %66 = arith.subf %62, %65 : vector<24x1xf32>
    %67 = math.exp %66 : vector<24x1xf32>
    %c0_56 = arith.constant 0 : index
    %c0_57 = arith.constant 0 : index
    %68 = vector.load %arg6[%c0_56, %c0_57] : memref<8x24xf32, #tpu.memory_space<vmem>>, vector<8x24xf32>
    %cst_58 = arith.constant dense<0.000000e+00> : vector<8x1xf32>
    %69 = tpu.matmul %68, %67, %cst_58 {dimension_numbers = #tpu.dot_dimension_numbers<[1], [0], [0], [1], [0, 0, 1, 1], [], []>} : vector<8x24xf32>, vector<24x1xf32>, vector<8x1xf32> -> vector<8x1xf32>
    %c0_59 = arith.constant 0 : index
    %c0_60 = arith.constant 0 : index
    %70 = vector.load %arg5[%c0_59, %c0_60] : memref<24x8xf32, #tpu.memory_space<vmem>>, vector<24x8xf32>
    %cst_61 = arith.constant dense<0.000000e+00> : vector<24x1xf32>
    %71 = tpu.matmul %70, %69, %cst_61 {dimension_numbers = #tpu.dot_dimension_numbers<[1], [0], [0], [1], [0, 0, 1, 1], [], []>} : vector<24x8xf32>, vector<8x1xf32>, vector<24x1xf32> -> vector<24x1xf32>
    %72 = arith.divf %67, %71 : vector<24x1xf32>
    %c0_62 = arith.constant 0 : index
    %c0_63 = arith.constant 0 : index
    %73 = vector.load %arg6[%c0_62, %c0_63] : memref<8x24xf32, #tpu.memory_space<vmem>>, vector<8x24xf32>
    %74 = vector.broadcast %72 : vector<24x1xf32> to vector<24x32xf32>
    %75 = arith.mulf %74, %46 : vector<24x32xf32>
    %cst_64 = arith.constant dense<0.000000e+00> : vector<8x32xf32>
    %76 = tpu.matmul %73, %75, %cst_64 {dimension_numbers = #tpu.dot_dimension_numbers<[1], [0], [0], [1], [0, 0, 1, 1], [], []>} : vector<8x24xf32>, vector<24x32xf32>, vector<8x32xf32> -> vector<8x32xf32>
    %c0_65 = arith.constant 0 : index
    %c0_66 = arith.constant 0 : index
    %77 = vector.load %arg25[%c0_65, %c0_66] : memref<64x64xf32, #tpu.memory_space<vmem>>, vector<64x64xf32>
    %cst_67 = arith.constant dense<0.000000e+00> : vector<8x64xf32>
    %78 = tpu.matmul %12, %77, %cst_67 {dimension_numbers = #tpu.dot_dimension_numbers<[1], [0], [0], [1], [0, 0, 1, 1], [], []>} : vector<8x64xf32>, vector<64x64xf32>, vector<8x64xf32> -> vector<8x64xf32>
    %c0_68 = arith.constant 0 : index
    %c0_69 = arith.constant 0 : index
    %79 = vector.load %arg26[%c0_68, %c0_69] : memref<32x64xf32, #tpu.memory_space<vmem>>, vector<32x64xf32>
    %cst_70 = arith.constant dense<0.000000e+00> : vector<8x64xf32>
    %80 = tpu.matmul %76, %79, %cst_70 {dimension_numbers = #tpu.dot_dimension_numbers<[1], [0], [0], [1], [0, 0, 1, 1], [], []>} : vector<8x32xf32>, vector<32x64xf32>, vector<8x64xf32> -> vector<8x64xf32>
    %81 = arith.addf %78, %80 : vector<8x64xf32>
    %c0_71 = arith.constant 0 : index
    %c0_72 = arith.constant 0 : index
    %82 = vector.load %arg27[%c0_71, %c0_72] : memref<1x64xf32, #tpu.memory_space<vmem>>, vector<1x64xf32>
    %83 = vector.broadcast %82 : vector<1x64xf32> to vector<8x64xf32>
    %84 = arith.addf %81, %83 : vector<8x64xf32>
    %85 = math.tanh %84 : vector<8x64xf32>
    %c0_73 = arith.constant 0 : index
    %c0_74 = arith.constant 0 : index
    %86 = vector.load %arg28[%c0_73, %c0_74] : memref<64x64xf32, #tpu.memory_space<vmem>>, vector<64x64xf32>
    %cst_75 = arith.constant dense<0.000000e+00> : vector<8x64xf32>
    %87 = tpu.matmul %85, %86, %cst_75 {dimension_numbers = #tpu.dot_dimension_numbers<[1], [0], [0], [1], [0, 0, 1, 1], [], []>} : vector<8x64xf32>, vector<64x64xf32>, vector<8x64xf32> -> vector<8x64xf32>
    %c0_76 = arith.constant 0 : index
    %c0_77 = arith.constant 0 : index
    %88 = vector.load %arg29[%c0_76, %c0_77] : memref<1x64xf32, #tpu.memory_space<vmem>>, vector<1x64xf32>
    %89 = vector.broadcast %88 : vector<1x64xf32> to vector<8x64xf32>
    %90 = arith.addf %87, %89 : vector<8x64xf32>
    %91 = math.tanh %90 : vector<8x64xf32>
    %c0_78 = arith.constant 0 : index
    %c0_79 = arith.constant 0 : index
    %92 = vector.load %arg30[%c0_78, %c0_79] : memref<64x128xf32, #tpu.memory_space<vmem>>, vector<64x128xf32>
    %cst_80 = arith.constant dense<0.000000e+00> : vector<8x128xf32>
    %93 = tpu.matmul %91, %92, %cst_80 {dimension_numbers = #tpu.dot_dimension_numbers<[1], [0], [0], [1], [0, 0, 1, 1], [], []>} : vector<8x64xf32>, vector<64x128xf32>, vector<8x128xf32> -> vector<8x128xf32>
    %c0_81 = arith.constant 0 : index
    %c0_82 = arith.constant 0 : index
    %94 = vector.load %arg31[%c0_81, %c0_82] : memref<1x128xf32, #tpu.memory_space<vmem>>, vector<1x128xf32>
    %95 = vector.broadcast %94 : vector<1x128xf32> to vector<8x128xf32>
    %96 = arith.addf %93, %95 : vector<8x128xf32>
    %c0_83 = arith.constant 0 : index
    %c0_84 = arith.constant 0 : index
    %97 = vector.load %arg32[%c0_83, %c0_84] : memref<8x128xf32, #tpu.memory_space<vmem>>, vector<8x128xf32>
    tpu.vector_store %arg32[%c0_83, %c0_84], %96 {strides = array<i32>} : memref<8x128xf32, #tpu.memory_space<vmem>>, vector<8x128xf32>,
    return
  }
  func.func @transform_0(%arg0: i32) -> (i32, i32) {
    %c0_i32 = arith.constant 0 : i32
    %c0_i32_0 = arith.constant 0 : i32
    return %arg0, %c0_i32 : i32, i32
  }
  func.func @transform_1(%arg0: i32) -> (i32, i32) {
    %c0_i32 = arith.constant 0 : i32
    %c0_i32_0 = arith.constant 0 : i32
    return %arg0, %c0_i32 : i32, i32
  }
  func.func @transform_2(%arg0: i32) -> (i32, i32) {
    %c0_i32 = arith.constant 0 : i32
    %c0_i32_0 = arith.constant 0 : i32
    return %arg0, %c0_i32 : i32, i32
  }
  func.func @transform_3(%arg0: i32) -> (i32, i32) {
    %c0_i32 = arith.constant 0 : i32
    %c0_i32_0 = arith.constant 0 : i32
    return %arg0, %c0_i32 : i32, i32
  }
  func.func @transform_4(%arg0: i32) -> (i32, i32) {
    %c0_i32 = arith.constant 0 : i32
    %c0_i32_0 = arith.constant 0 : i32
    %c0_i32_1 = arith.constant 0 : i32
    return %c0_i32, %c0_i32_0 : i32, i32
  }
  func.func @transform_5(%arg0: i32) -> (i32, i32) {
    %c0_i32 = arith.constant 0 : i32
    %c0_i32_0 = arith.constant 0 : i32
    %c0_i32_1 = arith.constant 0 : i32
    return %c0_i32, %c0_i32_0 : i32, i32
  }
  func.func @transform_6(%arg0: i32) -> (i32, i32) {
    %c0_i32 = arith.constant 0 : i32
    %c0_i32_0 = arith.constant 0 : i32
    %c0_i32_1 = arith.constant 0 : i32
    return %c0_i32, %c0_i32_0 : i32, i32
  }
  func.func @transform_7(%arg0: i32) -> (i32, i32) {
    %c0_i32 = arith.constant 0 : i32
    %c0_i32_0 = arith.constant 0 : i32
    %c0_i32_1 = arith.constant 0 : i32
    return %c0_i32, %c0_i32_0 : i32, i32
  }
  func.func @transform_8(%arg0: i32) -> (i32, i32) {
    %c0_i32 = arith.constant 0 : i32
    %c0_i32_0 = arith.constant 0 : i32
    %c0_i32_1 = arith.constant 0 : i32
    return %c0_i32, %c0_i32_0 : i32, i32
  }
  func.func @transform_9(%arg0: i32) -> (i32, i32) {
    %c0_i32 = arith.constant 0 : i32
    %c0_i32_0 = arith.constant 0 : i32
    %c0_i32_1 = arith.constant 0 : i32
    return %c0_i32, %c0_i32_0 : i32, i32
  }
  func.func @transform_10(%arg0: i32) -> (i32, i32) {
    %c0_i32 = arith.constant 0 : i32
    %c0_i32_0 = arith.constant 0 : i32
    %c0_i32_1 = arith.constant 0 : i32
    return %c0_i32, %c0_i32_0 : i32, i32
  }
  func.func @transform_11(%arg0: i32) -> (i32, i32) {
    %c0_i32 = arith.constant 0 : i32
    %c0_i32_0 = arith.constant 0 : i32
    %c0_i32_1 = arith.constant 0 : i32
    return %c0_i32, %c0_i32_0 : i32, i32
  }
  func.func @transform_12(%arg0: i32) -> (i32, i32) {
    %c0_i32 = arith.constant 0 : i32
    %c0_i32_0 = arith.constant 0 : i32
    %c0_i32_1 = arith.constant 0 : i32
    return %c0_i32, %c0_i32_0 : i32, i32
  }
  func.func @transform_13(%arg0: i32) -> (i32, i32) {
    %c0_i32 = arith.constant 0 : i32
    %c0_i32_0 = arith.constant 0 : i32
    %c0_i32_1 = arith.constant 0 : i32
    return %c0_i32, %c0_i32_0 : i32, i32
  }
  func.func @transform_14(%arg0: i32) -> (i32, i32) {
    %c0_i32 = arith.constant 0 : i32
    %c0_i32_0 = arith.constant 0 : i32
    %c0_i32_1 = arith.constant 0 : i32
    return %c0_i32, %c0_i32_0 : i32, i32
  }
  func.func @transform_15(%arg0: i32) -> (i32, i32) {
    %c0_i32 = arith.constant 0 : i32
    %c0_i32_0 = arith.constant 0 : i32
    %c0_i32_1 = arith.constant 0 : i32
    return %c0_i32, %c0_i32_0 : i32, i32
  }
  func.func @transform_16(%arg0: i32) -> (i32, i32) {
    %c0_i32 = arith.constant 0 : i32
    %c0_i32_0 = arith.constant 0 : i32
    %c0_i32_1 = arith.constant 0 : i32
    return %c0_i32, %c0_i32_0 : i32, i32
  }
  func.func @transform_17(%arg0: i32) -> (i32, i32) {
    %c0_i32 = arith.constant 0 : i32
    %c0_i32_0 = arith.constant 0 : i32
    %c0_i32_1 = arith.constant 0 : i32
    return %c0_i32, %c0_i32_0 : i32, i32
  }
  func.func @transform_18(%arg0: i32) -> (i32, i32) {
    %c0_i32 = arith.constant 0 : i32
    %c0_i32_0 = arith.constant 0 : i32
    %c0_i32_1 = arith.constant 0 : i32
    return %c0_i32, %c0_i32_0 : i32, i32
  }
  func.func @transform_19(%arg0: i32) -> (i32, i32) {
    %c0_i32 = arith.constant 0 : i32
    %c0_i32_0 = arith.constant 0 : i32
    %c0_i32_1 = arith.constant 0 : i32
    return %c0_i32, %c0_i32_0 : i32, i32
  }
  func.func @transform_20(%arg0: i32) -> (i32, i32) {
    %c0_i32 = arith.constant 0 : i32
    %c0_i32_0 = arith.constant 0 : i32
    %c0_i32_1 = arith.constant 0 : i32
    return %c0_i32, %c0_i32_0 : i32, i32
  }
  func.func @transform_21(%arg0: i32) -> (i32, i32) {
    %c0_i32 = arith.constant 0 : i32
    %c0_i32_0 = arith.constant 0 : i32
    %c0_i32_1 = arith.constant 0 : i32
    return %c0_i32, %c0_i32_0 : i32, i32
  }
  func.func @transform_22(%arg0: i32) -> (i32, i32) {
    %c0_i32 = arith.constant 0 : i32
    %c0_i32_0 = arith.constant 0 : i32
    %c0_i32_1 = arith.constant 0 : i32
    return %c0_i32, %c0_i32_0 : i32, i32
  }
  func.func @transform_23(%arg0: i32) -> (i32, i32) {
    %c0_i32 = arith.constant 0 : i32
    %c0_i32_0 = arith.constant 0 : i32
    %c0_i32_1 = arith.constant 0 : i32
    return %c0_i32, %c0_i32_0 : i32, i32
  }
  func.func @transform_24(%arg0: i32) -> (i32, i32) {
    %c0_i32 = arith.constant 0 : i32
    %c0_i32_0 = arith.constant 0 : i32
    %c0_i32_1 = arith.constant 0 : i32
    return %c0_i32, %c0_i32_0 : i32, i32
  }
  func.func @transform_25(%arg0: i32) -> (i32, i32) {
    %c0_i32 = arith.constant 0 : i32
    %c0_i32_0 = arith.constant 0 : i32
    %c0_i32_1 = arith.constant 0 : i32
    return %c0_i32, %c0_i32_0 : i32, i32
  }
  func.func @transform_26(%arg0: i32) -> (i32, i32) {
    %c0_i32 = arith.constant 0 : i32
    %c0_i32_0 = arith.constant 0 : i32
    %c0_i32_1 = arith.constant 0 : i32
    return %c0_i32, %c0_i32_0 : i32, i32
  }
  func.func @transform_27(%arg0: i32) -> (i32, i32) {
    %c0_i32 = arith.constant 0 : i32
    %c0_i32_0 = arith.constant 0 : i32
    %c0_i32_1 = arith.constant 0 : i32
    return %c0_i32, %c0_i32_0 : i32, i32
  }
  func.func @transform_28(%arg0: i32) -> (i32, i32) {
    %c0_i32 = arith.constant 0 : i32
    %c0_i32_0 = arith.constant 0 : i32
    %c0_i32_1 = arith.constant 0 : i32
    return %c0_i32, %c0_i32_0 : i32, i32
  }
  func.func @transform_29(%arg0: i32) -> (i32, i32) {
    %c0_i32 = arith.constant 0 : i32
    %c0_i32_0 = arith.constant 0 : i32
    %c0_i32_1 = arith.constant 0 : i32
    return %c0_i32, %c0_i32_0 : i32, i32
  }
  func.func @transform_30(%arg0: i32) -> (i32, i32) {
    %c0_i32 = arith.constant 0 : i32
    %c0_i32_0 = arith.constant 0 : i32
    %c0_i32_1 = arith.constant 0 : i32
    return %c0_i32, %c0_i32_0 : i32, i32
  }
  func.func @transform_31(%arg0: i32) -> (i32, i32) {
    %c0_i32 = arith.constant 0 : i32
    %c0_i32_0 = arith.constant 0 : i32
    return %arg0, %c0_i32 : i32, i32
  }
}

</mosaic_0001>

<bundles_post_ra>
// kernel: attn_mlp_forward.1
= control target key start
LH: loop header
LB: loop body
LE: loop exit
PB: predicated region body
PF: predicated region fallthrough
CT: control target
= control target key end

     0   :  { %v2411_v0 = vmov 0.0   ;;  %s2412_s3 = smov 6   ;;  %vm2413_vm0 = vmmov 0   ;;  %s2414_s10 = smov 10   ;;  %vm146_vm1 = vcmask 1044480   ;;  %vm142_vm2 = vcmask 105472   ;;  %s2793_s0 = inlined_call_operand.smem [shape: u32[32], index: -1, kind: input, shape index: {}] }
   0x1   :  { %2065 = vmatprep.subr.mxu1 %v2411_v0  ;;  %s1873_s6 = sld [smem:[%s2793_s0 + %s2412_s3]]   ;;  %2069 = vmatprep.mubr.msk.f32.mxu1 %vm2413_vm0, %v2411_v0  ;;  %s2415_s14 = smov 1   ;;  %vm322_vm3 = vcmask 39936   ;;  %vm236_vm4 = vcmask 523264   ;;  %vm429_vm5 = vcmask 261120   ;;  %v2420_v38 = vmov 0  }
   0x2   :  { %s1_s9 = sld [smem:[%s2793_s0]]   ;;  %2091 = vmatprep.subr.mxu0 %v2411_v0  ;;  %2093 = vmatprep.mubr.msk.f32.mxu0 %vm2413_vm0, %v2411_v0  ;;  %s2416_s18 = smov 8   ;;  %vm525_vm6 = vcmask 64512   ;;  %vm960_vm7 = vcmask 1043456   ;;  %vm950_vm8 = vcmask 31744   ;;  %vm1249_vm9 = vcmask 7168  }
   0x3   :  { %s1877_s13 = sld [smem:[%s2793_s0 + %s2414_s10]]   ;;  %s2417_s22 = smov 12   ;;  %2365 = vset.pattern.permute.xlu0 %v2420_v38  ;;  %2366 = vset.pattern.permute.xlu1 %v2420_v38  ;;  %vm1271_vm10 = vcmask 195584  }
   0x4   :  { %s1868_s17 = sld [smem:[%s2793_s0 + %s2415_s14]]   ;;  %s2418_s26 = smov 7  }
   0x5   :  { %s1875_s21 = sld [smem:[%s2793_s0 + %s2416_s18]]   ;;  %s2419_s30 = smov 11  }
   0x6   :  { %s1879_s25 = sld [smem:[%s2793_s0 + %s2417_s22]]   ;;  %s2421_s4 = smov 3  }
   0x7   :  { %v134_v1 = vld [vmem:[%s1873_s6 + $0x8] sm:$0x1f]  ;;  %v133_v2 = vld [vmem:[%s1873_s6] sm:$0xff]  ;;  %s1874_s29 = sld [smem:[%s2793_s0 + %s2418_s26]]   ;;  %s2422_s8 = smov 15  }
   0x8   :  { %2066 = vmatpush3.msk.msra.mxu1 %vm146_vm1, %v134_v1  ;;  %v132_v3 = vld [vmem:[%s1_s9] sm:$0xff]  ;;  %s1878_s3 = sld [smem:[%s2793_s0 + %s2419_s30]]   ;;  %s2423_s12 = smov 9  }
   0x9   :  { %2067 = vmatprep.subr.mxu1 %v2411_v0  ;;  %v314_v4 = vld [vmem:[%s1877_s13] sm:$0x1f]  ;;  %s1870_s7 = sld [smem:[%s2793_s0 + %s2421_s4]]   ;;  %s2424_s16 = smov 13  }
   0xa   :  { %2068 = vmatpush3.msra.mxu1 %v133_v2  ;;  %2092 = vmatpush3.msk.msra.mxu0 %vm146_vm1, %v314_v4  ;;  %v311_v5 = vld [vmem:[%s1868_s17] sm:$0xff]  ;;  %v312_v6 = vld [vmem:[%s1868_s17 + $0x8] sm:$0xff]  ;;  %v313_v10 = vld [vmem:[%s1868_s17 + $0x10] sm:$0xff]  ;;  %s1882_s11 = sld [smem:[%s2793_s0 + %s2422_s8]]   ;;  %s2425_s20 = smov 4  }
   0xb   :  { %2070 = vmatmul.mubr.msk.f32.vlgmr.msra.gmra.mxu1 %vm142_vm2, %v132_v3  ;;  %2094 = vmatmul.mubr.msk.f32.vlgmr.msra.gmra.mxu0 %vm322_vm3, %v311_v5  ;;  %v228_v7 = vld [vmem:[%s1875_s21 + $0x38] sm:$0xff]  ;;  %v227_v8 = vld [vmem:[%s1875_s21 + $0x30] sm:$0xff]  ;;  %v226_v9 = vld [vmem:[%s1875_s21 + $0x28] sm:$0xff]  ;;  %s1876_s15 = sld [smem:[%s2793_s0 + %s2423_s12]]   ;;  %s2426_s24 = smov 14  }
   0xc   :  { %2096 = vmatprep.mubr.msk.f32.mxu0 %vm2413_vm0, %v2411_v0  ;;  %2072 = vmatprep.subr.mxu1 %v2411_v0  ;;  %v225_v11 = vld [vmem:[%s1875_s21 + $0x20] sm:$0xff]  ;;  %v224_v12 = vld [vmem:[%s1875_s21 + $0x18] sm:$0xff]  ;;  %v223_v13 = vld [vmem:[%s1875_s21 + $0x10] sm:$0xff]  ;;  %s1880_s19 = sld [smem:[%s2793_s0 + %s2424_s16]]   ;;  %s2427_s28 = smov 17  }
   0xd   :  { %2088 = vmatprep.mubr.msk.f32.mxu1 %vm2413_vm0, %v2411_v0  ;;  %2102 = vmatprep.subr.mxu0 %v2411_v0  ;;  %v222_v14 = vld [vmem:[%s1875_s21 + $0x8] sm:$0xff]  ;;  %v221_v15 = vld [vmem:[%s1875_s21] sm:$0xff]  ;;  %v421_v16 = vld [vmem:[%s1879_s25 + $0x18] sm:$0xff]  ;;  %s1871_s23 = sld [smem:[%s2793_s0 + %s2425_s20]]   ;;  %s2428_s2 = smov 20  }
   0xe   :  { %2073 = vmatpush3.msra.mxu1 %v228_v7  ;;  %v420_v17 = vld [vmem:[%s1879_s25 + $0x10] sm:$0xff]  ;;  %2103 = vmatpush3.msra.mxu0 %v421_v16  ;;  %v419_v18 = vld [vmem:[%s1879_s25 + $0x8] sm:$0xff]  ;;  %v418_v19 = vld [vmem:[%s1879_s25] sm:$0xff]  ;;  %s2549_s27 = sld [smem:[%s2793_s0 + %s2426_s24]]   ;;  %s2429_s6 = smov 16  }
   0xf   :  { %2097 = vmatmul.mubr.msk.f32.gmra.mxu0 %vm322_vm3, %v312_v6  ;;  %2074 = vmatprep.subr.mxu1 %v2411_v0  ;;  %v1899_v20 = vld [vmem:[%s1874_s29] ss:$0 sm:$0xff]  ;;  %v2523_v40 = vld [vmem:[%s1870_s7 + $0x10] sm:$0xff]  ;;  %v2527_v41 = vld [vmem:[%s1870_s7 + $0x8] sm:$0xff]  ;;  %s1884_s1 = sld [smem:[%s2793_s0 + %s2427_s28]]   ;;  %s2430_s10 = smov 19  }
  0x10   :  { %2099 = vmatprep.mubr.msk.f32.mxu0 %vm2413_vm0, %v2411_v0  ;;  %2075 = vmatpush3.msra.mxu1 %v227_v8  ;;  %v1904_v21 = vld [vmem:[%s1878_s3] ss:$0 sm:$0xff]  ;;  %v650_v42 = vld [vmem:[%s1882_s11 + $0x18] sm:$0xff]  ;;  %v649_v43 = vld [vmem:[%s1882_s11 + $0x10] sm:$0xff]  ;;  %s1887_s5 = sld [smem:[%s2793_s0 + %s2428_s2]]   ;;  %s2431_s14 = smov 2  }
  0x11   :  { %2076 = vmatprep.subr.mxu1 %v2411_v0  ;;  %2104 = vmatprep.subr.mxu0 %v2411_v0  ;;  %v2521_v39 = vld [vmem:[%s1870_s7] sm:$0xff]  ;;  %v648_v44 = vld [vmem:[%s1882_s11 + $0x8] sm:$0xff]  ;;  %s1883_s9 = sld [smem:[%s2793_s0 + %s2429_s6]]   ;;  %s2432_s18 = smov 18  }
  0x12   :  { %2077 = vmatpush3.msra.mxu1 %v226_v9  ;;  %2105 = vmatpush3.msra.mxu0 %v420_v17  ;;  %v647_v45 = vld [vmem:[%s1882_s11] sm:$0xff]  ;;  %s1886_s13 = sld [smem:[%s2793_s0 + %s2430_s10]]   ;;  %s2433_s22 = smov 22  }
  0x13   :  { %2100 = vmatmul.mubr.msk.f32.gmra.mxu0 %vm322_vm3, %v313_v10  ;;  %2078 = vmatprep.subr.mxu1 %v2411_v0  ;;  %v1902_v46 = vld [vmem:[%s1876_s15] ss:$0 sm:$0xff]  ;;  %v2563_v58 = vld [vmem:[%s1871_s23 + $0x8] sm:$0xff]  ;;  %v2573_v61 = vld [vmem:[%s1871_s23 + $0x10] sm:$0xff]  ;;  %s1869_s17 = sld [smem:[%s2793_s0 + %s2431_s14]]   ;;  %s2434_s26 = smov 23  }
  0x14   :  { %2110 = vmatprep.mubr.msk.f32.mxu0 %vm2413_vm0, %v2411_v0  ;;  %2079 = vmatpush3.msra.mxu1 %v225_v11  ;;  %v1909_v52 = vld [vmem:[%s1880_s19] ss:$0 sm:$0xff]  ;;  %v643_v56 = vld [vmem:[%s2549_s27 + $0x38] sm:$0xff]  ;;  %v642_v57 = vld [vmem:[%s2549_s27 + $0x30] sm:$0xff]  ;;  %s1885_s21 = sld [smem:[%s2793_s0 + %s2432_s18]]   ;;  %s2435_s30 = smov 21  }
  0x15   :  { %2080 = vmatprep.subr.mxu1 %v2411_v0  ;;  %2106 = vmatprep.subr.mxu0 %v2411_v0  ;;  %v2551_v54 = vld [vmem:[%s1871_s23] sm:$0xff]  ;;  %v641_v59 = vld [vmem:[%s2549_s27 + $0x28] sm:$0xff]  ;;  %v639_v62 = vld [vmem:[%s2549_s27 + $0x18] sm:$0xff]  ;;  %s1889_s25 = sld [smem:[%s2793_s0 + %s2433_s22]]   ;;  %s2436_s4 = smov 5  }
  0x16   :  { %2081 = vmatpush3.msra.mxu1 %v224_v12  ;;  %2107 = vmatpush3.msra.mxu0 %v419_v18  ;;  %v640_v60 = vld [vmem:[%s2549_s27 + $0x20] sm:$0xff]  ;;  %v638_v63 = vld [vmem:[%s2549_s27 + $0x10] sm:$0xff]  ;;  %s1890_s29 = sld [smem:[%s2793_s0 + %s2434_s26]]   ;;  %s2437_s8 = smov 24  }
  0x17   :  { %2082 = vmatprep.subr.mxu1 %v2411_v0  ;;  %2108 = vmatprep.subr.mxu0 %v2411_v0  ;;  %s1888_s3 = sld [smem:[%s2793_s0 + %s2435_s30]]   ;;  %s2438_s12 = smov 25  }
  0x18   :  { %2083 = vmatpush3.msra.mxu1 %v223_v13  ;;  %2109 = vmatpush3.msra.mxu0 %v418_v19  ;;  %v637_v13 = vld [vmem:[%s2549_s27 + $0x8] sm:$0xff]  ;;  %s1872_s7 = sld [smem:[%s2793_s0 + %s2436_s4]]   ;;  %s2439_s16 = smov 27  }
  0x19   :  { %2084 = vmatprep.subr.mxu1 %v2411_v0  ;;  %2130 = vmatprep.subr.mxu0 %v2411_v0  ;;  %s1891_s11 = sld [smem:[%s2793_s0 + %s2437_s8]]   ;;  %s2440_s20 = smov 26  }
  0x1a   :  { %2085 = vmatpush3.msra.mxu1 %v222_v14  ;;  %620 = vperm.xlu0 %2365, %v2521_v39   ;;  %v636_v14 = vld [vmem:[%s2549_s27] sm:$0xff]  ;;  %s1892_s15 = sld [smem:[%s2793_s0 + %s2438_s12]]   ;;  %s2441_s24 = smov 29  }
  0x1b   :  { %2086 = vmatprep.subr.mxu1 %v2411_v0  ;;  %630 = vperm.xlu1 %2366, %v2523_v40   ;;  %s1894_s19 = sld [smem:[%s2793_s0 + %s2439_s16]]   ;;  %s2442_s28 = smov 28  }
  0x1c   :  { %2087 = vmatpush3.msra.mxu1 %v221_v15  ;;  %s1893_s23 = sld [smem:[%s2793_s0 + %s2440_s20]]   ;;  %s2443_s2 = smov 30  }
  0x1d   :  { %2119 = vmatprep.subr.mxu1 %v2411_v0  ;;  %s1896_s27 = sld [smem:[%s2793_s0 + %s2441_s24]]   ;;  %s2444_s6 = smov 31  }
  0x1e   :  { %625 = vperm.xlu0 %2365, %v2527_v41  }
  0x95   :  { %v621_v2 = vpop.permute.xlu0 %620 }
  0x96   :  { %v631_v16 = vpop.permute.xlu1 %630 }
  0x99   :  { %v626_v10 = vpop.permute.xlu0 %625 }
  0xcb   :  { %v216_v22 = vpop.f32.mrf.mxu1  ;;  %v401_v23 = vpop.f32.mrf.mxu0 }
  0xcc   :  { %v217_v24 = vadd.f32 %v1899_v20, %v216_v22  ;;  %v402_v25 = vadd.f32 %v1904_v21, %v401_v23 }
  0xcd   :  { %v2071_v26 = vpop.f32.mrf.mxu1  ;;  %v2095_v27 = vpop.f32.mrf.mxu0 }
  0xce   :  { %2367 = vtanh.f32 %v217_v24 }
  0xcf   :  { %2369 = vtanh.f32 %v402_v25  ;;  %v406_v30 = vpop.f32.mrf.mxu0 }
  0xd0   :  { %v407_v31 = vadd.f32 %v1904_v21, %v406_v30 }
  0xd1   :  { %v2098_v32 = vpop.f32.mrf.mxu0 }
  0xd2   :  { %2371 = vtanh.f32 %v407_v31 }
  0xd3   :  { %v411_v33 = vpop.f32.mrf.mxu0 }
  0xd4   :  { %v412_v34 = vadd.f32 %v1904_v21, %v411_v33  ;;  %v845_v33 = vld [vmem:[%s1884_s1 + $0x18] sm:$0xff] }
  0xd5   :  { %v2101_v35 = vpop.f32.mrf.mxu0 }
  0xd6   :  { %2373 = vtanh.f32 %v412_v34  ;;  %v844_v34 = vld [vmem:[%s1884_s1 + $0x10] sm:$0xff]  ;;  %v843_v35 = vld [vmem:[%s1884_s1 + $0x8] sm:$0xff] }
  0xdb   :  { %v2368_v28 = vpop.eup %2367 }
  0xdc   :  { %v2370_v29 = vpop.eup %2369  ;;  %2089 = vmatmul.mubr.msk.f32.vlgmr.msra.gmra.mxu1 %vm236_vm4, %v2368_v28 }
  0xdd   :  { %2111 = vmatmul.mubr.msk.f32.vlgmr.msra.gmra.mxu0 %vm429_vm5, %v2370_v29  ;;  %2121 = vmatprep.mubr.msk.f32.mxu1 %vm2413_vm0, %v2411_v0 }
  0xde   :  { %2113 = vmatprep.mubr.msk.f32.mxu0 %vm2413_vm0, %v2411_v0  ;;  %2131 = vmatpush3.msra.mxu0 %v650_v42  ;;  %v1922_v42 = vld [vmem:[%s1883_s9] ss:$0 sm:$0xff]  ;;  %s1898_s9 = sld [smem:[%s2793_s0 + %s2444_s6]]  }
  0xdf   :  { %v2372_v36 = vpop.eup %2371  ;;  %2132 = vmatprep.subr.mxu0 %v2411_v0 }
  0xe0   :  { %2133 = vmatpush3.msra.mxu0 %v649_v43 }
  0xe1   :  { %2114 = vmatmul.mubr.msk.f32.gmra.mxu0 %vm429_vm5, %v2372_v36  ;;  %2134 = vmatprep.subr.mxu0 %v2411_v0  ;;  %v842_v36 = vld [vmem:[%s1884_s1] sm:$0xff]  ;;  %s1895_s1 = sld [smem:[%s2793_s0 + %s2442_s28]]  }
  0xe2   :  { %2116 = vmatprep.mubr.msk.f32.mxu0 %vm2413_vm0, %v2411_v0  ;;  %2135 = vmatpush3.msra.mxu0 %v648_v44 }
  0xe3   :  { %v2374_v37 = vpop.eup %2373  ;;  %2136 = vmatprep.subr.mxu0 %v2411_v0 }
  0xe4   :  { %2137 = vmatpush3.msra.mxu0 %v647_v45 }
  0xe5   :  { %2117 = vmatmul.mubr.msk.f32.gmra.mxu0 %vm429_vm5, %v2374_v37  ;;  %2172 = vmatprep.subr.mxu0 %v2411_v0  ;;  %v949_v37 = vld [vmem:[%s1887_s5] sm:$0xf]  ;;  %s1897_s5 = sld [smem:[%s2793_s0 + %s2443_s2]]  }
  0xe6   :  { %2138 = vmatprep.mubr.msk.f32.mxu0 %vm2413_vm0, %v2411_v0 }
 0x19c   :  { %v306_v47 = vpop.f32.mrf.mxu1 }
 0x19d   :  { %v307_v48 = vadd.f32 %v1902_v46, %v306_v47  ;;  %v505_v49 = vpop.f32.mrf.mxu0 }
 0x19e   :  { %v2090_v50 = vpop.f32.mrf.mxu1  ;;  %v506_v53 = vadd.f32 %v1909_v52, %v505_v49 }
 0x19f   :  { %2375 = vtanh.f32 %v307_v48  ;;  %v2112_v51 = vpop.f32.mrf.mxu0 }
 0x1a0   :  { %2377 = vtanh.f32 %v506_v53 }
 0x1a1   :  { %v510_v4 = vpop.f32.mrf.mxu0 }
 0x1a2   :  { %v511_v5 = vadd.f32 %v1909_v52, %v510_v4  ;;  %v948_v4 = vld [vmem:[%s1869_s17 + $0x10] sm:$0xff] }
 0x1a3   :  { %v2115_v6 = vpop.f32.mrf.mxu0 }
 0x1a4   :  { %2379 = vtanh.f32 %v511_v5  ;;  %v1923_v5 = vld [vmem:[%s1885_s21] ss:$0 sm:$0xff] }
 0x1a5   :  { %v515_v7 = vpop.f32.mrf.mxu0 }
 0x1a6   :  { %v516_v8 = vadd.f32 %v1909_v52, %v515_v7 }
 0x1a7   :  { %v2118_v9 = vpop.f32.mrf.mxu0 }
 0x1a8   :  { %2381 = vtanh.f32 %v516_v8 }
 0x1ac   :  { %v2553_v55 = vpop.eup %2375 }
 0x1ad   :  { %2120 = vmatpush3.msra.mxu1 %v2553_v55  ;;  %v2378_v1 = vpop.eup %2377 }
 0x1ae   :  { %2122 = vmatmul.mubr.msk.f32.vlgmr.msra.gmra.mxu1 %vm525_vm6, %v2551_v54  ;;  %2147 = vmatprep.subr.mxu1 %v2411_v0  ;;  %v644_v3 = vmul.f32 %v2378_v1, %v621_v2  ;;  %v946_v1 = vld [vmem:[%s1869_s17] sm:$0xff] }
 0x1af   :  { %2124 = vmatprep.mubr.msk.f32.mxu1 %vm2413_vm0, %v2411_v0  ;;  %2148 = vmatpush3.msra.mxu1 %v643_v56  ;;  %v945_v56 = vld [vmem:[%s1886_s13 + $0x18] sm:$0xff] }
 0x1b0   :  { %2149 = vmatprep.subr.mxu1 %v2411_v0  ;;  %2139 = vmatmul.mubr.msk.f32.vlgmr.msra.gmra.mxu0 %vm429_vm5, %v644_v3  ;;  %v947_v3 = vld [vmem:[%s1869_s17 + $0x8] sm:$0xff] }
 0x1b1   :  { %2150 = vmatpush3.msra.mxu1 %v642_v57  ;;  %2141 = vmatprep.mubr.msk.f32.mxu0 %vm2413_vm0, %v2411_v0  ;;  %v2380_v11 = vpop.eup %2379 }
 0x1b2   :  { %2125 = vmatmul.mubr.msk.f32.gmra.mxu1 %vm525_vm6, %v2563_v58  ;;  %2151 = vmatprep.subr.mxu1 %v2411_v0  ;;  %v645_v12 = vmul.f32 %v2380_v11, %v626_v10 }
 0x1b3   :  { %2127 = vmatprep.mubr.msk.f32.mxu1 %vm2413_vm0, %v2411_v0  ;;  %2152 = vmatpush3.msra.mxu1 %v641_v59  ;;  %v944_v59 = vld [vmem:[%s1886_s13 + $0x10] sm:$0xff] }
 0x1b4   :  { %2153 = vmatprep.subr.mxu1 %v2411_v0  ;;  %2142 = vmatmul.mubr.msk.f32.gmra.mxu0 %vm429_vm5, %v645_v12 }
 0x1b5   :  { %2154 = vmatpush3.msra.mxu1 %v640_v60  ;;  %2144 = vmatprep.mubr.msk.f32.mxu0 %vm2413_vm0, %v2411_v0  ;;  %v2382_v15 = vpop.eup %2381 }
 0x1b6   :  { %2128 = vmatmul.mubr.msk.f32.gmra.mxu1 %vm525_vm6, %v2573_v61  ;;  %2155 = vmatprep.subr.mxu1 %v2411_v0  ;;  %v646_v17 = vmul.f32 %v2382_v15, %v631_v16 }
 0x1b7   :  { %2156 = vmatpush3.msra.mxu1 %v639_v62  ;;  %2163 = vmatprep.mubr.msk.f32.mxu1 %vm2413_vm0, %v2411_v0 }
 0x1b8   :  { %2157 = vmatprep.subr.mxu1 %v2411_v0  ;;  %2145 = vmatmul.mubr.msk.f32.gmra.mxu0 %vm429_vm5, %v646_v17 }
 0x1b9   :  { %2158 = vmatpush3.msra.mxu1 %v638_v63  ;;  %2180 = vmatprep.mubr.msk.f32.mxu0 %vm2413_vm0, %v2411_v0  ;;  %v943_v63 = vld [vmem:[%s1886_s13 + $0x8] sm:$0xff] }
 0x1ba   :  { %2159 = vmatprep.subr.mxu1 %v2411_v0  ;;  %2173 = vmatpush3.msra.mxu0 %v845_v33 }
 0x1bb   :  { %2160 = vmatpush3.msra.mxu1 %v637_v13  ;;  %2174 = vmatprep.subr.mxu0 %v2411_v0 }
 0x1bc   :  { %2161 = vmatprep.subr.mxu1 %v2411_v0  ;;  %2175 = vmatpush3.msra.mxu0 %v844_v34 }
 0x1bd   :  { %2162 = vmatpush3.msra.mxu1 %v636_v14  ;;  %2176 = vmatprep.subr.mxu0 %v2411_v0 }
 0x1be   :  { %2189 = vmatprep.subr.mxu1 %v2411_v0  ;;  %2177 = vmatpush3.msra.mxu0 %v843_v35 }
 0x1bf   :  { %2178 = vmatprep.subr.mxu0 %v2411_v0 }
 0x1c0   :  { %2179 = vmatpush3.msra.mxu0 %v842_v36 }
 0x1c1   :  { %2200 = vmatprep.subr.mxu0 %v2411_v0 }
 0x26e   :  { %v601_v18 = vpop.f32.mrf.mxu1 }
 0x26f   :  { %v633_v19 = vmul.f32 %v621_v2, %v601_v18  ;;  %v942_v2 = vld [vmem:[%s1886_s13] sm:$0xff] }
 0x270   :  { %v2123_v20 = vpop.f32.mrf.mxu1  ;;  %v726_v27 = vpop.f32.mrf.mxu0 }
 0x271   :  { %2164 = vmatmul.mubr.msk.f32.vlgmr.msra.gmra.mxu1 %vm236_vm4, %v633_v19 }
 0x272   :  { %v606_v21 = vpop.f32.mrf.mxu1  ;;  %2166 = vmatprep.mubr.msk.f32.mxu1 %vm2413_vm0, %v2411_v0  ;;  %v2140_v28 = vpop.f32.mrf.mxu0  ;;  %2190 = vmatpush3.msk.msra.mxu1 %vm960_vm7, %v949_v37 }
 0x273   :  { %v634_v22 = vmul.f32 %v626_v10, %v606_v21  ;;  %2217 = vmatprep.subr.mxu1 %v2411_v0  ;;  %v1149_v21 = vld [vmem:[%s1889_s25 + $0x18] sm:$0xff] }
 0x274   :  { %v2126_v23 = vpop.f32.mrf.mxu1  ;;  %v731_v29 = vpop.f32.mrf.mxu0 }
 0x275   :  { %2167 = vmatmul.mubr.msk.f32.gmra.mxu1 %vm236_vm4, %v634_v22  ;;  %v1148_v22 = vld [vmem:[%s1889_s25 + $0x10] sm:$0xff]  ;;  %v1147_v23 = vld [vmem:[%s1889_s25 + $0x8] sm:$0xff] }
 0x276   :  { %v611_v24 = vpop.f32.mrf.mxu1  ;;  %2169 = vmatprep.mubr.msk.f32.mxu1 %vm2413_vm0, %v2411_v0  ;;  %v2143_v30 = vpop.f32.mrf.mxu0 }
 0x277   :  { %v635_v25 = vmul.f32 %v631_v16, %v611_v24  ;;  %v1146_v24 = vld [vmem:[%s1889_s25] sm:$0xff] }
 0x278   :  { %v2129_v26 = vpop.f32.mrf.mxu1  ;;  %v736_v31 = vpop.f32.mrf.mxu0 }
 0x279   :  { %2170 = vmatmul.mubr.msk.f32.gmra.mxu1 %vm236_vm4, %v635_v25  ;;  %v68_v25 = vstv %s1890_s29 }
 0x27a   :  { %2191 = vmatprep.mubr.msk.f32.mxu1 %vm2413_vm0, %v2411_v0  ;;  %v2146_v32 = vpop.f32.mrf.mxu0  ;;  %69 = vst [vmem:[#allocation2] sm:$0x1] %v68_v25  ;;  %v1523_v25 = vld [vmem:[%s1891_s11 + $0x20] sm:$0xff] }
 0x27d   :  { %2192 = vmatmul.mubr.msk.f32.vlgmr.msra.gmra.mxu1 %vm950_vm8, %v946_v1 }
 0x27e   :  { %2194 = vmatprep.mubr.msk.f32.mxu1 %vm2413_vm0, %v2411_v0  ;;  %2218 = vmatpush3.msra.mxu1 %v1149_v21  ;;  %v1526_v21 = vld [vmem:[%s1891_s11 + $0x38] sm:$0xff] }
 0x27f   :  { %2219 = vmatprep.subr.mxu1 %v2411_v0 }
 0x280   :  { %2220 = vmatpush3.msra.mxu1 %v1148_v22 }
 0x281   :  { %2195 = vmatmul.mubr.msk.f32.gmra.mxu1 %vm950_vm8, %v947_v3  ;;  %2221 = vmatprep.subr.mxu1 %v2411_v0 }
 0x282   :  { %2197 = vmatprep.mubr.msk.f32.mxu1 %vm2413_vm0, %v2411_v0  ;;  %2222 = vmatpush3.msra.mxu1 %v1147_v23  ;;  %v1525_v23 = vld [vmem:[%s1891_s11 + $0x30] sm:$0xff] }
 0x283   :  { %2223 = vmatprep.subr.mxu1 %v2411_v0 }
 0x284   :  { %2224 = vmatpush3.msra.mxu1 %v1146_v24  ;;  %v1524_v24 = vld [vmem:[%s1891_s11 + $0x28] sm:$0xff] }
 0x285   :  { %2198 = vmatmul.mubr.msk.f32.gmra.mxu1 %vm950_vm8, %v948_v4  ;;  %2254 = vmatprep.subr.mxu1 %v2411_v0 }
 0x286   :  { %2225 = vmatprep.mubr.msk.f32.mxu1 %vm2413_vm0, %v2411_v0 }
 0x331   :  { %v815_v38 = vpop.f32.mrf.mxu1 }
 0x332   :  { %v816_v43 = vadd.f32 %v815_v38, %v726_v27  ;;  %v1934_v27 = vld [vmem:[%s1888_s3] ss:$0 sm:$0xff] }
 0x333   :  { %v2165_v44 = vpop.f32.mrf.mxu1 }
 0x334   :  { %v836_v45 = vadd.f32 %v1922_v42, %v816_v43 }
 0x335   :  { %v820_v46 = vpop.f32.mrf.mxu1 }
 0x336   :  { %2383 = vtanh.f32 %v836_v45  ;;  %v821_v47 = vadd.f32 %v820_v46, %v731_v29  ;;  %v1935_v45 = vld [vmem:[#allocation2] ss:$0 sm:$0xff] }
 0x337   :  { %v2168_v48 = vpop.f32.mrf.mxu1 }
 0x338   :  { %v837_v49 = vadd.f32 %v1922_v42, %v821_v47 }
 0x339   :  { %v825_v50 = vpop.f32.mrf.mxu1 }
 0x33a   :  { %2385 = vtanh.f32 %v837_v49  ;;  %v826_v51 = vadd.f32 %v825_v50, %v736_v31 }
 0x33b   :  { %v2171_v52 = vpop.f32.mrf.mxu1 }
 0x33c   :  { %v838_v53 = vadd.f32 %v1922_v42, %v826_v51 }
 0x33d   :  { %v1030_v15 = vpop.f32.mrf.mxu1 }
 0x33e   :  { %2387 = vtanh.f32 %v838_v53 }
 0x33f   :  { %v2193_v16 = vpop.f32.mrf.mxu1 }
 0x341   :  { %v1035_v17 = vpop.f32.mrf.mxu1 }
 0x343   :  { %v2384_v57 = vpop.eup %2383  ;;  %v2196_v18 = vpop.f32.mrf.mxu1 }
 0x344   :  { %2181 = vmatmul.mubr.msk.f32.vlgmr.msra.gmra.mxu0 %vm429_vm5, %v2384_v57  ;;  %v2699_v18 = vld [vmem:[%s1872_s7] sm:$0xff] }
 0x345   :  { %2183 = vmatprep.mubr.msk.f32.mxu0 %vm2413_vm0, %v2411_v0  ;;  %2201 = vmatpush3.msra.mxu0 %v945_v56  ;;  %v1040_v19 = vpop.f32.mrf.mxu1 }
 0x346   :  { %2202 = vmatprep.subr.mxu0 %v2411_v0 }
 0x347   :  { %v2386_v60 = vpop.eup %2385  ;;  %2203 = vmatpush3.msra.mxu0 %v944_v59  ;;  %v2199_v20 = vpop.f32.mrf.mxu1 }
 0x348   :  { %2184 = vmatmul.mubr.msk.f32.gmra.mxu0 %vm429_vm5, %v2386_v60  ;;  %2204 = vmatprep.subr.mxu0 %v2411_v0 }
 0x349   :  { %2186 = vmatprep.mubr.msk.f32.mxu0 %vm2413_vm0, %v2411_v0  ;;  %2205 = vmatpush3.msra.mxu0 %v943_v63 }
 0x34a   :  { %2206 = vmatprep.subr.mxu0 %v2411_v0 }
 0x34b   :  { %v2388_v62 = vpop.eup %2387  ;;  %2207 = vmatpush3.msra.mxu0 %v942_v2 }
 0x34c   :  { %2187 = vmatmul.mubr.msk.f32.gmra.mxu0 %vm429_vm5, %v2388_v62  ;;  %2234 = vmatprep.subr.mxu0 %v2411_v0 }
 0x34d   :  { %2208 = vmatprep.mubr.msk.f32.mxu0 %vm2413_vm0, %v2411_v0 }
 0x404   :  { %v928_v6 = vpop.f32.mrf.mxu0 }
 0x405   :  { %v2649_v7 = vadd.f32 %v1923_v5, %v928_v6 }
 0x406   :  { %v2182_v8 = vpop.f32.mrf.mxu0 }
 0x407   :  { %2209 = vmatmul.mubr.msk.f32.vlgmr.msra.gmra.mxu0 %vm429_vm5, %v2649_v7 }
 0x408   :  { %v933_v9 = vpop.f32.mrf.mxu0  ;;  %2211 = vmatprep.mubr.msk.f32.mxu0 %vm2413_vm0, %v2411_v0 }
 0x409   :  { %v2655_v10 = vadd.f32 %v1923_v5, %v933_v9 }
 0x40a   :  { %v2185_v11 = vpop.f32.mrf.mxu0 }
 0x40b   :  { %2212 = vmatmul.mubr.msk.f32.gmra.mxu0 %vm429_vm5, %v2655_v10 }
 0x40c   :  { %v938_v12 = vpop.f32.mrf.mxu0  ;;  %2214 = vmatprep.mubr.msk.f32.mxu0 %vm2413_vm0, %v2411_v0 }
 0x40d   :  { %v2661_v13 = vadd.f32 %v1923_v5, %v938_v12 }
 0x40e   :  { %v2188_v14 = vpop.f32.mrf.mxu0 }
 0x40f   :  { %2215 = vmatmul.mubr.msk.f32.gmra.mxu0 %vm429_vm5, %v2661_v13 }
 0x410   :  { %2240 = vmatprep.mubr.msk.f32.mxu0 %vm2413_vm0, %v2411_v0 }
 0x4c7   :  { %v1119_v26 = vpop.f32.mrf.mxu0 }
 0x4c8   :  { %v1120_v28 = vadd.f32 %v1119_v26, %v1030_v15  ;;  %v1521_v26 = vld [vmem:[%s1891_s11 + $0x10] sm:$0xff] }
 0x4c9   :  { %v2210_v29 = vpop.f32.mrf.mxu0 }
 0x4ca   :  { %v1140_v30 = vadd.f32 %v1934_v27, %v1120_v28 }
 0x4cb   :  { %v1124_v31 = vpop.f32.mrf.mxu0 }
 0x4cc   :  { %2389 = vtanh.f32 %v1140_v30  ;;  %v1125_v32 = vadd.f32 %v1124_v31, %v1035_v17 }
 0x4cd   :  { %v2213_v33 = vpop.f32.mrf.mxu0 }
 0x4ce   :  { %v1141_v34 = vadd.f32 %v1934_v27, %v1125_v32 }
 0x4cf   :  { %v1129_v35 = vpop.f32.mrf.mxu0 }
 0x4d0   :  { %2391 = vtanh.f32 %v1141_v34  ;;  %v1130_v36 = vadd.f32 %v1129_v35, %v1040_v19 }
 0x4d1   :  { %v2216_v37 = vpop.f32.mrf.mxu0 }
 0x4d2   :  { %v1142_v38 = vadd.f32 %v1934_v27, %v1130_v36  ;;  %v1519_v27 = vld [vmem:[%s1891_s11] sm:$0xff] }
 0x4d4   :  { %2393 = vtanh.f32 %v1142_v38 }
 0x4d9   :  { %v2390_v42 = vpop.eup %2389 }
 0x4da   :  { %2226 = vmatmul.mubr.msk.f32.vlgmr.msra.gmra.mxu1 %vm429_vm5, %v2390_v42 }
 0x4db   :  { %2228 = vmatprep.mubr.msk.f32.mxu1 %vm2413_vm0, %v2411_v0 }
 0x4dd   :  { %v2392_v43 = vpop.eup %2391 }
 0x4de   :  { %2229 = vmatmul.mubr.msk.f32.gmra.mxu1 %vm429_vm5, %v2392_v43 }
 0x4df   :  { %2231 = vmatprep.mubr.msk.f32.mxu1 %vm2413_vm0, %v2411_v0 }
 0x4e1   :  { %v2394_v44 = vpop.eup %2393 }
 0x4e2   :  { %2232 = vmatmul.mubr.msk.f32.gmra.mxu1 %vm429_vm5, %v2394_v44 }
 0x4e3   :  { %2260 = vmatprep.mubr.msk.f32.mxu1 %vm2413_vm0, %v2411_v0 }
 0x59a   :  { %v1232_v46 = vpop.f32.mrf.mxu1 }
 0x59b   :  { %v1233_v48 = vadd.f32 %v1935_v45, %v1232_v46 }
 0x59c   :  { %v2227_v47 = vpop.f32.mrf.mxu1 }
 0x59d   :  { %v1246_v52 = vmul.f32 %v1233_v48, %v2521_v39 }
 0x59e   :  { %v1237_v49 = vpop.f32.mrf.mxu1 }
 0x59f   :  { %v1238_v50 = vadd.f32 %v1935_v45, %v1237_v49  ;;  %v1250_v62 = vsel %vm1249_vm9, %v1246_v52, -inf  ;;  %v1530_v49 = vld [vmem:[%s1892_s15 + $0x18] sm:$0xff] }
 0x5a0   :  { %v2230_v51 = vpop.f32.mrf.mxu1 }
 0x5a1   :  { %v1247_v53 = vmul.f32 %v1238_v50, %v2527_v41  ;;  %v1529_v50 = vld [vmem:[%s1892_s15 + $0x10] sm:$0xff] }
 0x5a2   :  { %v1242_v56 = vpop.f32.mrf.mxu1 }
 0x5a3   :  { %v1251_v57 = vsel %vm1249_vm9, %v1247_v53, -inf  ;;  %v1243_v59 = vadd.f32 %v1935_v45, %v1242_v56  ;;  %v1691_v56 = vld [vmem:[%s1894_s19 + $0x28] sm:$0xff] }
 0x5a4   :  { %v2233_v60 = vpop.f32.mrf.mxu1  ;;  %v1253_v1 = vmax.f32 %v1250_v62, %v1251_v57  ;;  %v1690_v57 = vld [vmem:[%s1894_s19 + $0x20] sm:$0xff]  ;;  %v1687_v62 = vld [vmem:[%s1894_s19 + $0x8] sm:$0xff] }
 0x5a5   :  { %v1248_v63 = vmul.f32 %v1243_v59, %v2523_v40  ;;  %v1689_v59 = vld [vmem:[%s1894_s19 + $0x18] sm:$0xff]  ;;  %v1688_v60 = vld [vmem:[%s1894_s19 + $0x10] sm:$0xff] }
 0x5a7   :  { %v1252_v2 = vsel %vm1249_vm9, %v1248_v63, -inf }
 0x5a8   :  { %v1254_v3 = vmax.f32 %v1253_v1, %v1252_v2  ;;  %v1946_v2 = vld [vmem:[%s1893_s23] ss:$0 sm:$0xff] }
 0x5aa   :  { %v1255_v4 = vrot.slane %v1254_v3, 4 }
 0x5ac   :  { %v1256_v5 = vmax.f32 %v1254_v3, %v1255_v4 }
 0x5ae   :  { %v1257_v6 = vrot.slane %v1256_v5, 2 }
 0x5b0   :  { %v1258_v8 = vmax.f32 %v1256_v5, %v1257_v6 }
 0x5b2   :  { %v1259_v9 = vrot.slane %v1258_v8, 1 }
 0x5b4   :  { %v1260_v11 = vmax.f32 %v1258_v8, %v1259_v9  ;;  %v1782_v8 = vld [vmem:[%s1896_s27 + $0x38] sm:$0xff]  ;;  %v1781_v9 = vld [vmem:[%s1896_s27 + $0x30] sm:$0xff] }
 0x5b6   :  { %v1262_v39 = vsub.f32 %v1247_v53, %v1260_v11  ;;  %v1263_v12 = vsub.f32 %v1248_v63, %v1260_v11  ;;  %v1261_v41 = vsub.f32 %v1246_v52, %v1260_v11  ;;  %v1693_v52 = vld [vmem:[%s1894_s19 + $0x38] sm:$0xff]  ;;  %v1692_v53 = vld [vmem:[%s1894_s19 + $0x30] sm:$0xff]  ;;  %v1686_v63 = vld [vmem:[%s1894_s19] sm:$0xff] }
 0x5b7   :  { %v1780_v11 = vld [vmem:[%s1896_s27 + $0x28] sm:$0xff] }
 0x5b8   :  { %v1268_v14 = vmul.f32 1.442695, %v1263_v12  ;;  %v1266_v15 = vmul.f32 1.442695, %v1262_v39  ;;  %v1264_v16 = vmul.f32 1.442695, %v1261_v41 }
 0x5b9   :  { %v1779_v39 = vld [vmem:[%s1896_s27 + $0x20] sm:$0xff]  ;;  %v1778_v12 = vld [vmem:[%s1896_s27 + $0x18] sm:$0xff]  ;;  %v1777_v41 = vld [vmem:[%s1896_s27 + $0x10] sm:$0xff] }
 0x5ba   :  { %2395 = vpow2.f32 %v1268_v14  ;;  %v1776_v14 = vld [vmem:[%s1896_s27 + $0x8] sm:$0xff] }
 0x5bb   :  { %2397 = vpow2.f32 %v1266_v15  ;;  %v1775_v15 = vld [vmem:[%s1896_s27] sm:$0xff] }
 0x5bc   :  { %2399 = vpow2.f32 %v1264_v16  ;;  %v1947_v16 = vld [vmem:[%s1895_s1] ss:$0 sm:$0xff] }
 0x5c7   :  { %v2695_v40 = vpop.eup %2395 }
 0x5c8   :  { %2235 = vmatpush3.msra.mxu0 %v2695_v40  ;;  %v2398_v17 = vpop.eup %2397 }
 0x5c9   :  { %2236 = vmatprep.subr.mxu0 %v2411_v0  ;;  %v2400_v19 = vpop.eup %2399 }
 0x5ca   :  { %2237 = vmatpush3.msra.mxu0 %v2398_v17 }
 0x5cb   :  { %2238 = vmatprep.subr.mxu0 %v2411_v0 }
 0x5cc   :  { %2239 = vmatpush3.msra.mxu0 %v2400_v19 }
 0x5cd   :  { %2241 = vmatmul.mubr.msk.f32.vlgmr.msra.gmra.mxu0 %vm1271_vm10, %v2699_v18  ;;  %2243 = vmatprep.subr.mxu0 %v2411_v0 }
 0x5ce   :  { %2245 = vmatprep.mubr.msk.f32.mxu0 %vm2413_vm0, %v2411_v0 }
 0x68d   :  { %v1341_v20 = vpop.f32.mrf.mxu0 }
 0x68e   :  { %2244 = vmatpush3.msra.mxu0 %v1341_v20 }
 0x68f   :  { %v2242_v22 = vpop.f32.mrf.mxu0  ;;  %2246 = vmatmul.mubr.msk.f32.vlgmr.msra.gmra.mxu0 %vm525_vm6, %v2551_v54  ;;  %2274 = vmatprep.subr.mxu0 %v2411_v0  ;;  %v1522_v54 = vld [vmem:[%s1891_s11 + $0x18] sm:$0xff] }
 0x690   :  { %2275 = vmatpush3.msra.mxu0 %v1526_v21  ;;  %2248 = vmatprep.mubr.msk.f32.mxu0 %vm2413_vm0, %v2411_v0 }
 0x691   :  { %2276 = vmatprep.subr.mxu0 %v2411_v0 }
 0x692   :  { %2277 = vmatpush3.msra.mxu0 %v1525_v23 }
 0x693   :  { %2249 = vmatmul.mubr.msk.f32.gmra.mxu0 %vm525_vm6, %v2563_v58  ;;  %2278 = vmatprep.subr.mxu0 %v2411_v0  ;;  %v1520_v58 = vld [vmem:[%s1891_s11 + $0x8] sm:$0xff] }
 0x694   :  { %2279 = vmatpush3.msra.mxu0 %v1524_v24  ;;  %2251 = vmatprep.mubr.msk.f32.mxu0 %vm2413_vm0, %v2411_v0 }
 0x695   :  { %2280 = vmatprep.subr.mxu0 %v2411_v0 }
 0x696   :  { %2281 = vmatpush3.msra.mxu0 %v1523_v25 }
 0x697   :  { %2252 = vmatmul.mubr.msk.f32.gmra.mxu0 %vm525_vm6, %v2573_v61  ;;  %2282 = vmatprep.subr.mxu0 %v2411_v0 }
 0x698   :  { %2283 = vmatpush3.msra.mxu0 %v1522_v54  ;;  %2290 = vmatprep.mubr.msk.f32.mxu0 %vm2413_vm0, %v2411_v0 }
 0x699   :  { %2284 = vmatprep.subr.mxu0 %v2411_v0 }
 0x69a   :  { %2285 = vmatpush3.msra.mxu0 %v1521_v26 }
 0x69b   :  { %2286 = vmatprep.subr.mxu0 %v2411_v0 }
 0x69c   :  { %2287 = vmatpush3.msra.mxu0 %v1520_v58 }
 0x69d   :  { %2288 = vmatprep.subr.mxu0 %v2411_v0 }
 0x69e   :  { %2289 = vmatpush3.msra.mxu0 %v1519_v27 }
 0x69f   :  { %2291 = vmatmul.mubr.msk.f32.vlgmr.msra.gmra.mxu0 %vm236_vm4, %v2553_v55  ;;  %2312 = vmatprep.subr.mxu0 %v2411_v0 }
 0x6a0   :  { %2328 = vmatprep.mubr.msk.f32.mxu0 %vm2413_vm0, %v2411_v0  ;;  %2313 = vmatpush3.msra.mxu0 %v1782_v8 }
 0x6a1   :  { %2314 = vmatprep.subr.mxu0 %v2411_v0 }
 0x6a2   :  { %2315 = vmatpush3.msra.mxu0 %v1781_v9 }
 0x6a3   :  { %2316 = vmatprep.subr.mxu0 %v2411_v0 }
 0x6a4   :  { %2317 = vmatpush3.msra.mxu0 %v1780_v11 }
 0x6a5   :  { %2318 = vmatprep.subr.mxu0 %v2411_v0 }
 0x6a6   :  { %2319 = vmatpush3.msra.mxu0 %v1779_v39 }
 0x6a7   :  { %2320 = vmatprep.subr.mxu0 %v2411_v0 }
 0x6a8   :  { %2321 = vmatpush3.msra.mxu0 %v1778_v12 }
 0x6a9   :  { %2322 = vmatprep.subr.mxu0 %v2411_v0 }
 0x6aa   :  { %2323 = vmatpush3.msra.mxu0 %v1777_v41 }
 0x6ab   :  { %2324 = vmatprep.subr.mxu0 %v2411_v0 }
 0x6ac   :  { %2325 = vmatpush3.msra.mxu0 %v1776_v14 }
 0x6ad   :  { %2326 = vmatprep.subr.mxu0 %v2411_v0 }
 0x6ae   :  { %2327 = vmatpush3.msra.mxu0 %v1775_v15 }
 0x74f   :  { %v1411_v61 = vpop.f32.mrf.mxu0 }
 0x751   :  { %v2247_v28 = vpop.f32.mrf.mxu0 }
 0x753   :  { %v1416_v29 = vpop.f32.mrf.mxu0 }
 0x754   :  { %2401 = vrcp.f32 %v1416_v29 }
 0x755   :  { %v2250_v30 = vpop.f32.mrf.mxu0 }
 0x757   :  { %v1421_v31 = vpop.f32.mrf.mxu0 }
 0x758   :  { %2403 = vrcp.f32 %v1421_v31 }
 0x759   :  { %v2253_v32 = vpop.f32.mrf.mxu0  ;;  %2405 = vrcp.f32 %v1411_v61 }
 0x75f   :  { %v2735_v33 = vpop.f32.mrf.mxu0 }
 0x761   :  { %v2402_v34 = vpop.eup %2401  ;;  %v2292_v35 = vpop.f32.mrf.mxu0 }
 0x762   :  { %v1428_v36 = vmul.f32 %v2402_v34, %v2398_v17 }
 0x764   :  { %1438 = vperm.xlu0 %2365, %v1428_v36  }
 0x765   :  { %v2404_v55 = vpop.eup %2403 }
 0x766   :  { %v1430_v37 = vmul.f32 %v2404_v55, %v2695_v40  ;;  %v2406_v38 = vpop.eup %2405 }
 0x767   :  { %v1426_v42 = vmul.f32 %v2406_v38, %v2400_v19 }
 0x768   :  { %1443 = vperm.xlu1 %2366, %v1430_v37  }
 0x76c   :  { %1433 = vperm.xlu1 %2366, %v1426_v42  }
 0x7df   :  { %v1439_v43 = vpop.permute.xlu0 %1438 }
 0x7e0   :  { %v1447_v46 = vmul.f32 %v1439_v43, %v2655_v10  ;;  %v1528_v10 = vld [vmem:[%s1892_s15 + $0x8] sm:$0xff] }
 0x7e3   :  { %v1444_v44 = vpop.permute.xlu1 %1443 }
 0x7e4   :  { %v1448_v45 = vmul.f32 %v1444_v44, %v2661_v13 }
 0x7e6   :  { %2255 = vmatpush3.msra.mxu1 %v1448_v45 }
 0x7e7   :  { %2256 = vmatprep.subr.mxu1 %v2411_v0  ;;  %v1434_v47 = vpop.permute.xlu1 %1433 }
 0x7e8   :  { %v1446_v48 = vmul.f32 %v1434_v47, %v2649_v7  ;;  %2257 = vmatpush3.msra.mxu1 %v1447_v46  ;;  %v1527_v7 = vld [vmem:[%s1892_s15] sm:$0xff] }
 0x7e9   :  { %2258 = vmatprep.subr.mxu1 %v2411_v0 }
 0x7ea   :  { %2259 = vmatpush3.msra.mxu1 %v1446_v48 }
 0x7eb   :  { %2261 = vmatmul.mubr.msk.f32.vlgmr.msra.gmra.mxu1 %vm1271_vm10, %v2699_v18  ;;  %2263 = vmatprep.subr.mxu1 %v2411_v0 }
 0x7ec   :  { %2264 = vmatpush3.msra.mxu1 %v1530_v49  ;;  %2271 = vmatprep.mubr.msk.f32.mxu1 %vm2413_vm0, %v2411_v0 }
 0x7ed   :  { %2265 = vmatprep.subr.mxu1 %v2411_v0 }
 0x7ee   :  { %2266 = vmatpush3.msra.mxu1 %v1529_v50 }
 0x7ef   :  { %2267 = vmatprep.subr.mxu1 %v2411_v0 }
 0x7f0   :  { %2268 = vmatpush3.msra.mxu1 %v1528_v10 }
 0x7f1   :  { %2269 = vmatprep.subr.mxu1 %v2411_v0 }
 0x7f2   :  { %2270 = vmatpush3.msra.mxu1 %v1527_v7 }
 0x7f3   :  { %2293 = vmatprep.subr.mxu1 %v2411_v0 }
 0x8ab   :  { %v1515_v13 = vpop.f32.mrf.mxu1 }
 0x8ac   :  { %2272 = vmatmul.mubr.msk.f32.vlgmr.msra.gmra.mxu1 %vm429_vm5, %v1515_v13 }
 0x8ad   :  { %v2262_v51 = vpop.f32.mrf.mxu1  ;;  %2309 = vmatprep.mubr.msk.f32.mxu1 %vm2413_vm0, %v2411_v0  ;;  %2294 = vmatpush3.msra.mxu1 %v1693_v52 }
 0x8ae   :  { %2295 = vmatprep.subr.mxu1 %v2411_v0 }
 0x8af   :  { %2296 = vmatpush3.msra.mxu1 %v1692_v53 }
 0x8b0   :  { %2297 = vmatprep.subr.mxu1 %v2411_v0 }
 0x8b1   :  { %2298 = vmatpush3.msra.mxu1 %v1691_v56 }
 0x8b2   :  { %2299 = vmatprep.subr.mxu1 %v2411_v0 }
 0x8b3   :  { %2300 = vmatpush3.msra.mxu1 %v1690_v57 }
 0x8b4   :  { %2301 = vmatprep.subr.mxu1 %v2411_v0 }
 0x8b5   :  { %2302 = vmatpush3.msra.mxu1 %v1689_v59 }
 0x8b6   :  { %2303 = vmatprep.subr.mxu1 %v2411_v0 }
 0x8b7   :  { %2304 = vmatpush3.msra.mxu1 %v1688_v60 }
 0x8b8   :  { %2305 = vmatprep.subr.mxu1 %v2411_v0 }
 0x8b9   :  { %2306 = vmatpush3.msra.mxu1 %v1687_v62 }
 0x8ba   :  { %2307 = vmatprep.subr.mxu1 %v2411_v0  ;;  %v1949_v0 = vld [vmem:[%s1897_s5] ss:$0 sm:$0xff] }
 0x8bb   :  { %2308 = vmatpush3.msra.mxu1 %v1686_v63 }
 0x96c   :  { %v1600_v1 = vpop.f32.mrf.mxu1 }
 0x96d   :  { %v1674_v3 = vadd.f32 %v2735_v33, %v1600_v1 }
 0x96e   :  { %v2273_v4 = vpop.f32.mrf.mxu1 }
 0x96f   :  { %v1684_v5 = vadd.f32 %v1946_v2, %v1674_v3 }
 0x971   :  { %2407 = vtanh.f32 %v1684_v5 }
 0x97e   :  { %v2408_v6 = vpop.eup %2407 }
 0x97f   :  { %2310 = vmatmul.mubr.msk.f32.vlgmr.msra.gmra.mxu1 %vm236_vm4, %v2408_v6 }
 0xa3f   :  { %v1770_v40 = vpop.f32.mrf.mxu1 }
 0xa40   :  { %v1771_v17 = vadd.f32 %v1947_v16, %v1770_v40 }
 0xa41   :  { %v2311_v18 = vpop.f32.mrf.mxu1 }
 0xa42   :  { %2409 = vtanh.f32 %v1771_v17 }
 0xa4f   :  { %v2410_v19 = vpop.eup %2409 }
 0xa50   :  { %2329 = vmatmul.mubr.msk.f32.vlgmr.msra.gmra.mxu0 %vm236_vm4, %v2410_v19 }
 0xb10   :  { %v1859_v20 = vpop.f32.mrf.mxu0 }
 0xb11   :  { %v1860_v21 = vadd.f32 %v1949_v0, %v1859_v20 }
 0xb12   :  { %v2330_v22 = vpop.f32.mrf.mxu0 }
 0xb13   :  { %1863 = vst [vmem:[%s1898_s9] sm:$0xff] %v1860_v21 }

</bundles_post_ra>
